<compile_context>
chip_gen: v7x
topology: tpu7x:2x2x1
jax: 0.10.0
libtpu: 0.0.40
codegen_flags: <defaults>
</compile_context>

<pallas_src>
import functools

import jax
import jax.numpy as jnp
from jax import lax
from jax.experimental import pallas as pl
from jax.experimental.pallas import tpu as pltpu

_K = 7                    # AttentionGate conv kernel size
_PAD = (_K - 1) // 2      # = 3 (same padding)


# --------------------------------- kernel ---------------------------------

def _triplet_kernel(b_ref, t_hw_ref, t_cw_ref, t_hc_ref, x_ref, o_ref,
                    pad_hw, pad_cw, pad_hc, s_cw_ref, s_hc_ref, *, C, H, W, CC):
    """One batch image per grid step.  x_ref/o_ref: (C, H, W)."""
    nchunks = C // CC
    inv_c = 1.0 / C
    inv_h = 1.0 / H
    inv_w = 1.0 / W

    # Zero only the 3-row top/bottom halos of the padded ZPool maps (the column
    # boundaries are folded into the banded weight matrices, so there is no column
    # halo).  Interiors are fully overwritten below, so each grid step is
    # self-contained and safe under dimension_semantics=("parallel",).
    pad_hw[0:_PAD, :] = jnp.zeros((_PAD, 2 * W), jnp.float32)
    pad_hw[H + _PAD:H + 2 * _PAD, :] = jnp.zeros((_PAD, 2 * W), jnp.float32)
    pad_cw[0:_PAD, :] = jnp.zeros((_PAD, 2 * W), jnp.float32)
    pad_cw[C + _PAD:C + 2 * _PAD, :] = jnp.zeros((_PAD, 2 * W), jnp.float32)
    pad_hc[0:_PAD, :] = jnp.zeros((_PAD, 2 * H), jnp.float32)
    pad_hc[C + _PAD:C + 2 * _PAD, :] = jnp.zeros((_PAD, 2 * H), jnp.float32)

    def chunk_start(k):
        if isinstance(k, int):
            return k * CC
        return pl.multiple_of(k * CC, CC)

    # ---- Phase 1: ZPool reductions streamed over channel chunks (bounds live ranges;
    #      no full-size f32 copy of x is ever materialised).
    def zpool_chunk(k, carry):
        mx_hw, sm_hw = carry
        c0 = chunk_start(k)
        xc = x_ref[pl.ds(c0, CC), :, :].astype(jnp.float32)            # (CC, H, W)
        # hw gate: reduce over channels (leading dim -> plain vreg max/add).
        mx_hw = jnp.maximum(mx_hw, jnp.max(xc, axis=0))
        sm_hw = sm_hw + jnp.sum(xc, axis=0)
        # cw gate: reduce over H (sublane dim); map is a (C, W) image.
        pad_cw[pl.ds(c0 + _PAD, CC), 0:W] = jnp.max(xc, axis=1)
        pad_cw[pl.ds(c0 + _PAD, CC), W:2 * W] = jnp.sum(xc, axis=1) * inv_h
        # hc gate: reduce over W (lane dim); map kept transposed as a (C, H) image so
        # no full-tensor transpose is needed (transposed 7x7 weights used instead).
        # TODO(synk): the sum could go through the MXU (ones-vector matmul) to take the
        # cross-lane reduction off the XLU; kept as jnp reductions for robustness.
        pad_hc[pl.ds(c0 + _PAD, CC), 0:H] = jnp.max(xc, axis=2)
        pad_hc[pl.ds(c0 + _PAD, CC), H:2 * H] = jnp.sum(xc, axis=2) * inv_w
        return mx_hw, sm_hw

    carry0 = (jnp.full((H, W), -jnp.inf, jnp.float32),
              jnp.zeros((H, W), jnp.float32))
    if nchunks == 1:
        mx_hw, sm_hw = zpool_chunk(0, carry0)
    else:
        mx_hw, sm_hw = lax.fori_loop(0, nchunks, zpool_chunk, carry0)
    pad_hw[_PAD:_PAD + H, 0:W] = mx_hw
    pad_hw[_PAD:_PAD + H, W:2 * W] = sm_hw * inv_c

    # ---- Phase 2: the three 7x7 AttentionGate convs as banded-matrix matmuls on the
    #      MXU:  conv = sum_i  pad[i:i+R, :] @ T[i]   (7 small matmuls per gate).
    def conv_gate(pad_ref, t_ref, bias, rows):
        cols = t_ref.shape[2]
        acc = jnp.zeros((rows, cols), jnp.float32)
        for i in range(_K):                                   # 7 iterations, tiny schedule
            acc = acc + jnp.dot(pad_ref[i:i + rows, :], t_ref[i],
                                preferred_element_type=jnp.float32)
        # folded-BN bias + sigmoid; the 1/3 branch average is folded into the small maps
        return jax.nn.sigmoid(acc + bias) * (1.0 / 3.0)

    s_hw = conv_gate(pad_hw, t_hw_ref, b_ref[0], H)           # (H, W)
    s_cw_ref[...] = conv_gate(pad_cw, t_cw_ref, b_ref[1], C)  # (C, W)
    s_hc_ref[...] = conv_gate(pad_hc, t_hc_ref, b_ref[2], C)  # (C, H), transposed map

    # ---- Phase 3: out = x * (s_hw + s_cw + s_hc), streamed over channel chunks so the
    #      full-size f32 "total" tensor is never materialised.
    def scale_chunk(k, _):
        c0 = chunk_start(k)
        xc = x_ref[pl.ds(c0, CC), :, :].astype(jnp.float32)            # (CC, H, W)
        scw = s_cw_ref[pl.ds(c0, CC), :]                               # (CC, W)
        shc = s_hc_ref[pl.ds(c0, CC), :]                               # (CC, H)
        tot = s_hw[None, :, :] + scw[:, None, :] + shc[:, :, None]
        o_ref[pl.ds(c0, CC), :, :] = (xc * tot).astype(o_ref.dtype)
        return 0

    if nchunks == 1:
        scale_chunk(0, 0)
    else:
        lax.fori_loop(0, nchunks, scale_chunk, 0)


# --------------------------------- wrapper ---------------------------------

def _fold_bn(gate_params, eps=1e-5):
    """Fold eval-mode BatchNorm into the (bias-free) 7x7 conv."""
    w = gate_params["w"]                                                 # (1, 2, 7, 7)
    scale = gate_params["gamma"] / jnp.sqrt(gate_params["var"] + eps)    # (1,)
    w_f = (w[0] * scale[0]).astype(jnp.float32)                          # (2, 7, 7)
    b_f = (gate_params["beta"] - gate_params["mean"] * scale).astype(jnp.float32)
    return w_f, b_f


def _banded_weights(k_eff, s):
    """Banded (Toeplitz) matrices for the minor-axis 7-tap filter.

    k_eff: (2, 7, 7) folded conv weights [channel, row-tap, col-tap].
    Returns T of shape (7, 2*s, s) with T[i, ch*s + sp, so] = k_eff[ch, i, sp - so + 3]
    (zero outside the band), so that  pad_rows[i:i+R, :] @ T[i]  applies the 7-tap
    filter along the minor axis including the 'same' zero padding at the boundaries.
    """
    sp = jnp.arange(s)[:, None]
    so = jnp.arange(s)[None, :]
    j = sp - so + _PAD
    valid = ((j >= 0) & (j < _K)).astype(k_eff.dtype)
    jc = jnp.clip(j, 0, _K - 1)
    t = k_eff[:, :, jc] * valid[None, None]                              # (2, 7, s, s)
    return jnp.transpose(t, (1, 0, 2, 3)).reshape(_K, 2 * s, s).astype(jnp.float32)


def _round_up(x, m):
    return -(-x // m) * m


def _vmem_tile_bytes(shape, dtype):
    """Rough VMEM footprint: last two dims padded to the (8, 128) vreg tile."""
    itemsize = jnp.dtype(dtype).itemsize
    if len(shape) == 1:
        return _round_up(shape[0], 128) * itemsize
    lead = 1
    for d in shape[:-2]:
        lead *= d
    return lead * _round_up(shape[-2], 8) * _round_up(shape[-1], 128) * itemsize


def _pick_c_chunk(c, h, w, budget_bytes=2 << 20):
    """Largest divisor-of-C chunk whose f32 slab stays within a small VMEM budget."""
    per_c = _vmem_tile_bytes((1, h, w), jnp.float32)
    cc = int(max(1, min(c, budget_bytes // max(per_c, 1))))
    while c % cc:
        cc -= 1
    return cc


def triplet_attention(x, params):
    """TripletAttention forward. x: (B, C, H, W). params: dict of 'hw'/'cw'/'hc' gates."""
    b, c, h, w = x.shape
    itemsize = jnp.dtype(x.dtype).itemsize

    w_hw, b_hw = _fold_bn(params["hw"])
    w_cw, b_cw = _fold_bn(params["cw"])
    w_hc, b_hc = _fold_bn(params["hc"])
    t_hw = _banded_weights(w_hw, w)                                   # (7, 2W, W)
    t_cw = _banded_weights(w_cw, w)                                   # (7, 2W, W)
    # hc map is stored transposed as (C, H) -> use the transposed 7x7 weights.
    t_hc = _banded_weights(jnp.transpose(w_hc, (0, 2, 1)), h)         # (7, 2H, H)
    biases = jnp.concatenate([b_hw, b_cw, b_hc]).astype(jnp.float32)  # (3,)

    cc = _pick_c_chunk(c, h, w)
    kernel = functools.partial(_triplet_kernel, C=c, H=h, W=w, CC=cc)

    # ---- VMEM budget, generation aware (blocks are double buffered by the pipeline).
    blk = _vmem_tile_bytes((c, h, w), x.dtype)
    t_bytes = sum(_vmem_tile_bytes(t.shape, jnp.float32) for t in (t_hw, t_cw, t_hc))
    scratch_bytes = (_vmem_tile_bytes((h + 2 * _PAD, 2 * w), jnp.float32)
                     + _vmem_tile_bytes((c + 2 * _PAD, 2 * w), jnp.float32)
                     + _vmem_tile_bytes((c + 2 * _PAD, 2 * h), jnp.float32)
                     + _vmem_tile_bytes((c, w), jnp.float32)
                     + _vmem_tile_bytes((c, h), jnp.float32))
    temp_bytes = 8 * _vmem_tile_bytes((cc, h, w), jnp.float32)
    need = 2 * 2 * blk + 2 * t_bytes + scratch_bytes + temp_bytes + (4 << 20)
    try:
        vmem_cap = int(pltpu.get_tpu_info().vmem_capacity_bytes)
    except Exception:
        vmem_cap = 64 << 20          # v7x per-TensorCore VMEM (smallest generation)
    vmem_limit = int(min(vmem_cap * 9 // 10, max(need, 32 << 20)))

    n_maps = h * w + c * w + c * h
    cost = pl.CostEstimate(
        flops=int(b * (9 * c * h * w
                       + 2 * _K * (2 * w) * (h * w + c * w)
                       + 2 * _K * (2 * h) * (c * h))),
        transcendentals=int(b * n_maps),
        bytes_accessed=int(2 * b * c * h * w * itemsize),
    )

    smem_spec = pl.BlockSpec(memory_space=pltpu.MemorySpace.SMEM)
    return pl.pallas_call(
        kernel,
        out_shape=jax.ShapeDtypeStruct(x.shape, x.dtype),
        grid_spec=pltpu.PrefetchScalarGridSpec(
            num_scalar_prefetch=0,
            grid=(b,),                                                # one image per step
            in_specs=[
                smem_spec,                                            # folded biases
                pl.BlockSpec(t_hw.shape, lambda i: (0, 0, 0)),        # banded hw weights
                pl.BlockSpec(t_cw.shape, lambda i: (0, 0, 0)),        # banded cw weights
                pl.BlockSpec(t_hc.shape, lambda i: (0, 0, 0)),        # banded hc weights
                pl.BlockSpec((None, c, h, w), lambda i: (i, 0, 0, 0)),
            ],
            out_specs=pl.BlockSpec((None, c, h, w), lambda i: (i, 0, 0, 0)),
            scratch_shapes=[
                pltpu.VMEM((h + 2 * _PAD, 2 * w), jnp.float32),   # padded hw ZPool map
                pltpu.VMEM((c + 2 * _PAD, 2 * w), jnp.float32),   # padded cw ZPool map
                pltpu.VMEM((c + 2 * _PAD, 2 * h), jnp.float32),   # padded hc map (transposed)
                pltpu.VMEM((c, w), jnp.float32),                  # s_cw attention map
                pltpu.VMEM((c, h), jnp.float32),                  # s_hc attention map
            ],
        ),
        compiler_params=pltpu.CompilerParams(
            dimension_semantics=("parallel",),
            vmem_limit_bytes=vmem_limit,
        ),
        cost_estimate=cost,
    )(biases, t_hw, t_cw, t_hc, x)


# ------------------------- pure-JAX reference (matches PyTorch) -------------------------

def _gate_ref(xp, p, eps=1e-5):
    mx = jnp.max(xp, axis=1, keepdims=True)
    mn = jnp.mean(xp, axis=1, keepdims=True)
    pooled = jnp.concatenate([mx, mn], axis=1)                 # ZPool: (B, 2, Hs, Ws)
    conv = jax.lax.conv_general_dilated(
        pooled, p["w"], window_strides=(1, 1),
        padding=((_PAD, _PAD), (_PAD, _PAD)),
        dimension_numbers=("NCHW", "OIHW", "NCHW"),
        precision=jax.lax.Precision.HIGHEST)
    g = (p["gamma"] / jnp.sqrt(p["var"] + eps)).reshape(1, -1, 1, 1)
    bn = (conv - p["mean"].reshape(1, -1, 1, 1)) * g + p["beta"].reshape(1, -1, 1, 1)
    return xp * jax.nn.sigmoid(bn)


def triplet_attention_ref(x, params):
    xp1 = jnp.transpose(x, (0, 2, 1, 3))
    o1 = jnp.transpose(_gate_ref(xp1, params["cw"]), (0, 2, 1, 3))
    xp2 = jnp.transpose(x, (0, 3, 2, 1))
    o2 = jnp.transpose(_gate_ref(xp2, params["hc"]), (0, 3, 2, 1))
    o3 = _gate_ref(x, params["hw"])
    return (1.0 / 3.0) * (o3 + o1 + o2)


if __name__ == "__main__":
    key = jax.random.PRNGKey(0)
    kx, k_hw, k_cw, k_hc = jax.random.split(key, 4)

    B, C, H, W = 2, 4, 16, 16
    x = jax.random.normal(kx, (B, C, H, W), dtype=jnp.float32)

    def make_gate_params(k):
        k1, k2, k3, k4, k5 = jax.random.split(k, 5)
        fan_in = 2 * _K * _K
        return {
            "w": jax.random.normal(k1, (1, 2, _K, _K), jnp.float32) * (1.0 / fan_in) ** 0.5,
            "gamma": 1.0 + 0.1 * jax.random.normal(k2, (1,), jnp.float32),
            "beta": 0.1 * jax.random.normal(k3, (1,), jnp.float32),
            "mean": 0.1 * jax.random.normal(k4, (1,), jnp.float32),
            "var": 1.0 + 0.5 * jax.random.uniform(k5, (1,), jnp.float32),
        }

    params = {"hw": make_gate_params(k_hw),
              "cw": make_gate_params(k_cw),
              "hc": make_gate_params(k_hc)}

    out = triplet_attention(x, params)
    out = jax.block_until_ready(out)

    ref = triplet_attention_ref(x, params)
    assert out.shape == x.shape and out.dtype == x.dtype
    err = float(jnp.max(jnp.abs(out - ref)))
    # Tolerance covers MXU float32 emulation (multi-pass) rounding differences across
    # TPU generations; genuine implementation bugs produce errors orders of magnitude larger.
    assert jnp.allclose(out, ref, atol=5e-3, rtol=5e-3), f"mismatch vs reference, max err {err}"

    print("KERNEL_OK")
</pallas_src>

<mosaic_0001>
module attributes {stable_mosaic.version = 11 : i64} {
  func.func @_triplet_kernel(%arg0: i32, %arg1: memref<3xf32, #tpu.memory_space<smem>>, %arg2: memref<7x32x16xf32, #tpu.memory_space<vmem>>, %arg3: memref<7x32x16xf32, #tpu.memory_space<vmem>>, %arg4: memref<7x32x16xf32, #tpu.memory_space<vmem>>, %arg5: memref<1x4x16x16xf32, #tpu.memory_space<vmem>>, %arg6: memref<1x4x16x16xf32, #tpu.memory_space<vmem>>, %arg7: memref<22x32xf32, #tpu.memory_space<vmem>>, %arg8: memref<10x32xf32, #tpu.memory_space<vmem>>, %arg9: memref<10x32xf32, #tpu.memory_space<vmem>>, %arg10: memref<4x16xf32, #tpu.memory_space<vmem>>, %arg11: memref<4x16xf32, #tpu.memory_space<vmem>>) attributes {dimension_semantics = [#tpu.dimension_semantics<parallel>], iteration_bounds = array<i64: 2>, scalar_prefetch = 0 : i64, scratch_operands = 5 : i64, tpu.core_type = #tpu.core_type<tc>, window_params = [{transform_indices = @transform_0, window_bounds = array<i64: 3>}, {pipeline_mode = #tpu.pipeline_mode<synchronous>, transform_indices = @transform_1, window_bounds = array<i64: 7, 32, 16>}, {pipeline_mode = #tpu.pipeline_mode<synchronous>, transform_indices = @transform_2, window_bounds = array<i64: 7, 32, 16>}, {pipeline_mode = #tpu.pipeline_mode<synchronous>, transform_indices = @transform_3, window_bounds = array<i64: 7, 32, 16>}, {transform_indices = @transform_4, window_bounds = array<i64: 1, 4, 16, 16>}, {transform_indices = @transform_5, window_bounds = array<i64: 1, 4, 16, 16>}]} {
    %cst = arith.constant 0.000000e+00 : f32
    %0 = vector.broadcast %cst : f32 to vector<3x32xf32>
    %c0 = arith.constant 0 : index
    %c0_0 = arith.constant 0 : index
    %1 = vector.load %arg7[%c0, %c0_0] : memref<22x32xf32, #tpu.memory_space<vmem>>, vector<3x32xf32>
    tpu.vector_store %arg7[%c0, %c0_0], %0 {strides = array<i32>} : memref<22x32xf32, #tpu.memory_space<vmem>>, vector<3x32xf32>,
    %cst_1 = arith.constant 0.000000e+00 : f32
    %2 = vector.broadcast %cst_1 : f32 to vector<3x32xf32>
    %c19 = arith.constant 19 : index
    %c0_2 = arith.constant 0 : index
    %3 = vector.load %arg7[%c19, %c0_2] : memref<22x32xf32, #tpu.memory_space<vmem>>, vector<3x32xf32>
    tpu.vector_store %arg7[%c19, %c0_2], %2 {strides = array<i32>} : memref<22x32xf32, #tpu.memory_space<vmem>>, vector<3x32xf32>,
    %cst_3 = arith.constant 0.000000e+00 : f32
    %4 = vector.broadcast %cst_3 : f32 to vector<3x32xf32>
    %c0_4 = arith.constant 0 : index
    %c0_5 = arith.constant 0 : index
    %5 = vector.load %arg8[%c0_4, %c0_5] : memref<10x32xf32, #tpu.memory_space<vmem>>, vector<3x32xf32>
    tpu.vector_store %arg8[%c0_4, %c0_5], %4 {strides = array<i32>} : memref<10x32xf32, #tpu.memory_space<vmem>>, vector<3x32xf32>,
    %cst_6 = arith.constant 0.000000e+00 : f32
    %6 = vector.broadcast %cst_6 : f32 to vector<3x32xf32>
    %c7 = arith.constant 7 : index
    %c0_7 = arith.constant 0 : index
    %7 = vector.load %arg8[%c7, %c0_7] : memref<10x32xf32, #tpu.memory_space<vmem>>, vector<3x32xf32>
    tpu.vector_store %arg8[%c7, %c0_7], %6 {strides = array<i32>} : memref<10x32xf32, #tpu.memory_space<vmem>>, vector<3x32xf32>,
    %cst_8 = arith.constant 0.000000e+00 : f32
    %8 = vector.broadcast %cst_8 : f32 to vector<3x32xf32>
    %c0_9 = arith.constant 0 : index
    %c0_10 = arith.constant 0 : index
    %9 = vector.load %arg9[%c0_9, %c0_10] : memref<10x32xf32, #tpu.memory_space<vmem>>, vector<3x32xf32>
    tpu.vector_store %arg9[%c0_9, %c0_10], %8 {strides = array<i32>} : memref<10x32xf32, #tpu.memory_space<vmem>>, vector<3x32xf32>,
    %cst_11 = arith.constant 0.000000e+00 : f32
    %10 = vector.broadcast %cst_11 : f32 to vector<3x32xf32>
    %c7_12 = arith.constant 7 : index
    %c0_13 = arith.constant 0 : index
    %11 = vector.load %arg9[%c7_12, %c0_13] : memref<10x32xf32, #tpu.memory_space<vmem>>, vector<3x32xf32>
    tpu.vector_store %arg9[%c7_12, %c0_13], %10 {strides = array<i32>} : memref<10x32xf32, #tpu.memory_space<vmem>>, vector<3x32xf32>,
    %cst_14 = arith.constant 0xFF800000 : f32
    %12 = vector.broadcast %cst_14 : f32 to vector<16x16xf32>
    %cst_15 = arith.constant 0.000000e+00 : f32
    %13 = vector.broadcast %cst_15 : f32 to vector<16x16xf32>
    %c0_16 = arith.constant 0 : index
    %c0_17 = arith.constant 0 : index
    %c0_18 = arith.constant 0 : index
    %c0_19 = arith.constant 0 : index
    %14 = vector.load %arg5[%c0_16, %c0_17, %c0_18, %c0_19] : memref<1x4x16x16xf32, #tpu.memory_space<vmem>>, vector<1x4x16x16xf32>
    %15 = vector.shape_cast %14 : vector<1x4x16x16xf32> to vector<4x16x16xf32>
    %cst_20 = arith.constant dense<0xFF800000> : vector<16x16xf32>
    %16 = vector.multi_reduction <maximumf>, %15, %cst_20 [0] : vector<4x16x16xf32> to vector<16x16xf32>
    %17 = arith.maximumf %12, %16 : vector<16x16xf32>
    %cst_21 = arith.constant dense<0.000000e+00> : vector<16x16xf32>
    %18 = vector.multi_reduction <add>, %15, %cst_21 [0] : vector<4x16x16xf32> to vector<16x16xf32>
    %19 = arith.addf %13, %18 : vector<16x16xf32>
    %cst_22 = arith.constant dense<0xFF800000> : vector<4x16xf32>
    %20 = vector.multi_reduction <maximumf>, %15, %cst_22 [1] : vector<4x16x16xf32> to vector<4x16xf32>
    %c3 = arith.constant 3 : index
    %c0_23 = arith.constant 0 : index
    %21 = vector.load %arg8[%c3, %c0_23] : memref<10x32xf32, #tpu.memory_space<vmem>>, vector<4x16xf32>
    tpu.vector_store %arg8[%c3, %c0_23], %20 {strides = array<i32>} : memref<10x32xf32, #tpu.memory_space<vmem>>, vector<4x16xf32>,
    %cst_24 = arith.constant dense<0.000000e+00> : vector<4x16xf32>
    %22 = vector.multi_reduction <add>, %15, %cst_24 [1] : vector<4x16x16xf32> to vector<4x16xf32>
    %cst_25 = arith.constant 6.250000e-02 : f32
    %23 = vector.broadcast %cst_25 : f32 to vector<4x16xf32>
    %24 = arith.mulf %22, %23 : vector<4x16xf32>
    %c3_26 = arith.constant 3 : index
    %c16 = arith.constant 16 : index
    %25 = vector.load %arg8[%c3_26, %c16] : memref<10x32xf32, #tpu.memory_space<vmem>>, vector<4x16xf32>
    tpu.vector_store %arg8[%c3_26, %c16], %24 {strides = array<i32>} : memref<10x32xf32, #tpu.memory_space<vmem>>, vector<4x16xf32>,
    %cst_27 = arith.constant dense<0xFF800000> : vector<4x16xf32>
    %26 = vector.multi_reduction <maximumf>, %15, %cst_27 [2] : vector<4x16x16xf32> to vector<4x16xf32>
    %c3_28 = arith.constant 3 : index
    %c0_29 = arith.constant 0 : index
    %27 = vector.load %arg9[%c3_28, %c0_29] : memref<10x32xf32, #tpu.memory_space<vmem>>, vector<4x16xf32>
    tpu.vector_store %arg9[%c3_28, %c0_29], %26 {strides = array<i32>} : memref<10x32xf32, #tpu.memory_space<vmem>>, vector<4x16xf32>,
    %cst_30 = arith.constant dense<0.000000e+00> : vector<4x16xf32>
    %28 = vector.multi_reduction <add>, %15, %cst_30 [2] : vector<4x16x16xf32> to vector<4x16xf32>
    %cst_31 = arith.constant 6.250000e-02 : f32
    %29 = vector.broadcast %cst_31 : f32 to vector<4x16xf32>
    %30 = arith.mulf %28, %29 : vector<4x16xf32>
    %c3_32 = arith.constant 3 : index
    %c16_33 = arith.constant 16 : index
    %31 = vector.load %arg9[%c3_32, %c16_33] : memref<10x32xf32, #tpu.memory_space<vmem>>, vector<4x16xf32>
    tpu.vector_store %arg9[%c3_32, %c16_33], %30 {strides = array<i32>} : memref<10x32xf32, #tpu.memory_space<vmem>>, vector<4x16xf32>,
    %c3_34 = arith.constant 3 : index
    %c0_35 = arith.constant 0 : index
    %32 = vector.load %arg7[%c3_34, %c0_35] : memref<22x32xf32, #tpu.memory_space<vmem>>, vector<16x16xf32>
    tpu.vector_store %arg7[%c3_34, %c0_35], %17 {strides = array<i32>} : memref<22x32xf32, #tpu.memory_space<vmem>>, vector<16x16xf32>,
    %cst_36 = arith.constant 2.500000e-01 : f32
    %33 = vector.broadcast %cst_36 : f32 to vector<16x16xf32>
    %34 = arith.mulf %19, %33 : vector<16x16xf32>
    %c3_37 = arith.constant 3 : index
    %c16_38 = arith.constant 16 : index
    %35 = vector.load %arg7[%c3_37, %c16_38] : memref<22x32xf32, #tpu.memory_space<vmem>>, vector<16x16xf32>
    tpu.vector_store %arg7[%c3_37, %c16_38], %34 {strides = array<i32>} : memref<22x32xf32, #tpu.memory_space<vmem>>, vector<16x16xf32>,
    %c0_39 = arith.constant 0 : index
    %36 = memref.load %arg1[%c0_39] : memref<3xf32, #tpu.memory_space<smem>>
    %cst_40 = arith.constant 0.000000e+00 : f32
    %37 = vector.broadcast %cst_40 : f32 to vector<16x16xf32>
    %c0_41 = arith.constant 0 : index
    %c0_42 = arith.constant 0 : index
    %38 = vector.load %arg7[%c0_41, %c0_42] : memref<22x32xf32, #tpu.memory_space<vmem>>, vector<16x32xf32>
    %c0_43 = arith.constant 0 : index
    %c0_44 = arith.constant 0 : index
    %c0_45 = arith.constant 0 : index
    %39 = vector.load %arg2[%c0_43, %c0_44, %c0_45] : memref<7x32x16xf32, #tpu.memory_space<vmem>>, vector<1x32x16xf32>
    %40 = vector.shape_cast %39 : vector<1x32x16xf32> to vector<32x16xf32>
    %cst_46 = arith.constant dense<0.000000e+00> : vector<16x16xf32>
    %41 = tpu.matmul %38, %40, %cst_46 {dimension_numbers = #tpu.dot_dimension_numbers<[1], [0], [0], [1], [0, 0, 1, 1], [], []>} : vector<16x32xf32>, vector<32x16xf32>, vector<16x16xf32> -> vector<16x16xf32>
    %42 = arith.addf %37, %41 : vector<16x16xf32>
    %c1 = arith.constant 1 : index
    %c0_47 = arith.constant 0 : index
    %43 = vector.load %arg7[%c1, %c0_47] : memref<22x32xf32, #tpu.memory_space<vmem>>, vector<16x32xf32>
    %c1_48 = arith.constant 1 : index
    %c0_49 = arith.constant 0 : index
    %c0_50 = arith.constant 0 : index
    %44 = vector.load %arg2[%c1_48, %c0_49, %c0_50] : memref<7x32x16xf32, #tpu.memory_space<vmem>>, vector<1x32x16xf32>
    %45 = vector.shape_cast %44 : vector<1x32x16xf32> to vector<32x16xf32>
    %cst_51 = arith.constant dense<0.000000e+00> : vector<16x16xf32>
    %46 = tpu.matmul %43, %45, %cst_51 {dimension_numbers = #tpu.dot_dimension_numbers<[1], [0], [0], [1], [0, 0, 1, 1], [], []>} : vector<16x32xf32>, vector<32x16xf32>, vector<16x16xf32> -> vector<16x16xf32>
    %47 = arith.addf %42, %46 : vector<16x16xf32>
    %c2 = arith.constant 2 : index
    %c0_52 = arith.constant 0 : index
    %48 = vector.load %arg7[%c2, %c0_52] : memref<22x32xf32, #tpu.memory_space<vmem>>, vector<16x32xf32>
    %c2_53 = arith.constant 2 : index
    %c0_54 = arith.constant 0 : index
    %c0_55 = arith.constant 0 : index
    %49 = vector.load %arg2[%c2_53, %c0_54, %c0_55] : memref<7x32x16xf32, #tpu.memory_space<vmem>>, vector<1x32x16xf32>
    %50 = vector.shape_cast %49 : vector<1x32x16xf32> to vector<32x16xf32>
    %cst_56 = arith.constant dense<0.000000e+00> : vector<16x16xf32>
    %51 = tpu.matmul %48, %50, %cst_56 {dimension_numbers = #tpu.dot_dimension_numbers<[1], [0], [0], [1], [0, 0, 1, 1], [], []>} : vector<16x32xf32>, vector<32x16xf32>, vector<16x16xf32> -> vector<16x16xf32>
    %52 = arith.addf %47, %51 : vector<16x16xf32>
    %c3_57 = arith.constant 3 : index
    %c0_58 = arith.constant 0 : index
    %53 = vector.load %arg7[%c3_57, %c0_58] : memref<22x32xf32, #tpu.memory_space<vmem>>, vector<16x32xf32>
    %c3_59 = arith.constant 3 : index
    %c0_60 = arith.constant 0 : index
    %c0_61 = arith.constant 0 : index
    %54 = vector.load %arg2[%c3_59, %c0_60, %c0_61] : memref<7x32x16xf32, #tpu.memory_space<vmem>>, vector<1x32x16xf32>
    %55 = vector.shape_cast %54 : vector<1x32x16xf32> to vector<32x16xf32>
    %cst_62 = arith.constant dense<0.000000e+00> : vector<16x16xf32>
    %56 = tpu.matmul %53, %55, %cst_62 {dimension_numbers = #tpu.dot_dimension_numbers<[1], [0], [0], [1], [0, 0, 1, 1], [], []>} : vector<16x32xf32>, vector<32x16xf32>, vector<16x16xf32> -> vector<16x16xf32>
    %57 = arith.addf %52, %56 : vector<16x16xf32>
    %c4 = arith.constant 4 : index
    %c0_63 = arith.constant 0 : index
    %58 = vector.load %arg7[%c4, %c0_63] : memref<22x32xf32, #tpu.memory_space<vmem>>, vector<16x32xf32>
    %c4_64 = arith.constant 4 : index
    %c0_65 = arith.constant 0 : index
    %c0_66 = arith.constant 0 : index
    %59 = vector.load %arg2[%c4_64, %c0_65, %c0_66] : memref<7x32x16xf32, #tpu.memory_space<vmem>>, vector<1x32x16xf32>
    %60 = vector.shape_cast %59 : vector<1x32x16xf32> to vector<32x16xf32>
    %cst_67 = arith.constant dense<0.000000e+00> : vector<16x16xf32>
    %61 = tpu.matmul %58, %60, %cst_67 {dimension_numbers = #tpu.dot_dimension_numbers<[1], [0], [0], [1], [0, 0, 1, 1], [], []>} : vector<16x32xf32>, vector<32x16xf32>, vector<16x16xf32> -> vector<16x16xf32>
    %62 = arith.addf %57, %61 : vector<16x16xf32>
    %c5 = arith.constant 5 : index
    %c0_68 = arith.constant 0 : index
    %63 = vector.load %arg7[%c5, %c0_68] : memref<22x32xf32, #tpu.memory_space<vmem>>, vector<16x32xf32>
    %c5_69 = arith.constant 5 : index
    %c0_70 = arith.constant 0 : index
    %c0_71 = arith.constant 0 : index
    %64 = vector.load %arg2[%c5_69, %c0_70, %c0_71] : memref<7x32x16xf32, #tpu.memory_space<vmem>>, vector<1x32x16xf32>
    %65 = vector.shape_cast %64 : vector<1x32x16xf32> to vector<32x16xf32>
    %cst_72 = arith.constant dense<0.000000e+00> : vector<16x16xf32>
    %66 = tpu.matmul %63, %65, %cst_72 {dimension_numbers = #tpu.dot_dimension_numbers<[1], [0], [0], [1], [0, 0, 1, 1], [], []>} : vector<16x32xf32>, vector<32x16xf32>, vector<16x16xf32> -> vector<16x16xf32>
    %67 = arith.addf %62, %66 : vector<16x16xf32>
    %c6 = arith.constant 6 : index
    %c0_73 = arith.constant 0 : index
    %68 = vector.load %arg7[%c6, %c0_73] : memref<22x32xf32, #tpu.memory_space<vmem>>, vector<16x32xf32>
    %c6_74 = arith.constant 6 : index
    %c0_75 = arith.constant 0 : index
    %c0_76 = arith.constant 0 : index
    %69 = vector.load %arg2[%c6_74, %c0_75, %c0_76] : memref<7x32x16xf32, #tpu.memory_space<vmem>>, vector<1x32x16xf32>
    %70 = vector.shape_cast %69 : vector<1x32x16xf32> to vector<32x16xf32>
    %cst_77 = arith.constant dense<0.000000e+00> : vector<16x16xf32>
    %71 = tpu.matmul %68, %70, %cst_77 {dimension_numbers = #tpu.dot_dimension_numbers<[1], [0], [0], [1], [0, 0, 1, 1], [], []>} : vector<16x32xf32>, vector<32x16xf32>, vector<16x16xf32> -> vector<16x16xf32>
    %72 = arith.addf %67, %71 : vector<16x16xf32>
    %73 = vector.broadcast %36 : f32 to vector<16x16xf32>
    %74 = arith.addf %72, %73 : vector<16x16xf32>
    %75 = arith.negf %74 : vector<16x16xf32>
    %76 = math.exp %75 : vector<16x16xf32>
    %cst_78 = arith.constant 1.000000e+00 : f32
    %77 = vector.broadcast %cst_78 : f32 to vector<16x16xf32>
    %78 = arith.addf %77, %76 : vector<16x16xf32>
    %79 = arith.divf %77, %78 : vector<16x16xf32>
    %cst_79 = arith.constant 0.333333343 : f32
    %80 = vector.broadcast %cst_79 : f32 to vector<16x16xf32>
    %81 = arith.mulf %79, %80 : vector<16x16xf32>
    %c1_80 = arith.constant 1 : index
    %82 = memref.load %arg1[%c1_80] : memref<3xf32, #tpu.memory_space<smem>>
    %cst_81 = arith.constant 0.000000e+00 : f32
    %83 = vector.broadcast %cst_81 : f32 to vector<4x16xf32>
    %c0_82 = arith.constant 0 : index
    %c0_83 = arith.constant 0 : index
    %84 = vector.load %arg8[%c0_82, %c0_83] : memref<10x32xf32, #tpu.memory_space<vmem>>, vector<4x32xf32>
    %c0_84 = arith.constant 0 : index
    %c0_85 = arith.constant 0 : index
    %c0_86 = arith.constant 0 : index
    %85 = vector.load %arg3[%c0_84, %c0_85, %c0_86] : memref<7x32x16xf32, #tpu.memory_space<vmem>>, vector<1x32x16xf32>
    %86 = vector.shape_cast %85 : vector<1x32x16xf32> to vector<32x16xf32>
    %cst_87 = arith.constant dense<0.000000e+00> : vector<4x16xf32>
    %87 = tpu.matmul %84, %86, %cst_87 {dimension_numbers = #tpu.dot_dimension_numbers<[1], [0], [0], [1], [0, 0, 1, 1], [], []>} : vector<4x32xf32>, vector<32x16xf32>, vector<4x16xf32> -> vector<4x16xf32>
    %88 = arith.addf %83, %87 : vector<4x16xf32>
    %c1_88 = arith.constant 1 : index
    %c0_89 = arith.constant 0 : index
    %89 = vector.load %arg8[%c1_88, %c0_89] : memref<10x32xf32, #tpu.memory_space<vmem>>, vector<4x32xf32>
    %c1_90 = arith.constant 1 : index
    %c0_91 = arith.constant 0 : index
    %c0_92 = arith.constant 0 : index
    %90 = vector.load %arg3[%c1_90, %c0_91, %c0_92] : memref<7x32x16xf32, #tpu.memory_space<vmem>>, vector<1x32x16xf32>
    %91 = vector.shape_cast %90 : vector<1x32x16xf32> to vector<32x16xf32>
    %cst_93 = arith.constant dense<0.000000e+00> : vector<4x16xf32>
    %92 = tpu.matmul %89, %91, %cst_93 {dimension_numbers = #tpu.dot_dimension_numbers<[1], [0], [0], [1], [0, 0, 1, 1], [], []>} : vector<4x32xf32>, vector<32x16xf32>, vector<4x16xf32> -> vector<4x16xf32>
    %93 = arith.addf %88, %92 : vector<4x16xf32>
    %c2_94 = arith.constant 2 : index
    %c0_95 = arith.constant 0 : index
    %94 = vector.load %arg8[%c2_94, %c0_95] : memref<10x32xf32, #tpu.memory_space<vmem>>, vector<4x32xf32>
    %c2_96 = arith.constant 2 : index
    %c0_97 = arith.constant 0 : index
    %c0_98 = arith.constant 0 : index
    %95 = vector.load %arg3[%c2_96, %c0_97, %c0_98] : memref<7x32x16xf32, #tpu.memory_space<vmem>>, vector<1x32x16xf32>
    %96 = vector.shape_cast %95 : vector<1x32x16xf32> to vector<32x16xf32>
    %cst_99 = arith.constant dense<0.000000e+00> : vector<4x16xf32>
    %97 = tpu.matmul %94, %96, %cst_99 {dimension_numbers = #tpu.dot_dimension_numbers<[1], [0], [0], [1], [0, 0, 1, 1], [], []>} : vector<4x32xf32>, vector<32x16xf32>, vector<4x16xf32> -> vector<4x16xf32>
    %98 = arith.addf %93, %97 : vector<4x16xf32>
    %c3_100 = arith.constant 3 : index
    %c0_101 = arith.constant 0 : index
    %99 = vector.load %arg8[%c3_100, %c0_101] : memref<10x32xf32, #tpu.memory_space<vmem>>, vector<4x32xf32>
    %c3_102 = arith.constant 3 : index
    %c0_103 = arith.constant 0 : index
    %c0_104 = arith.constant 0 : index
    %100 = vector.load %arg3[%c3_102, %c0_103, %c0_104] : memref<7x32x16xf32, #tpu.memory_space<vmem>>, vector<1x32x16xf32>
    %101 = vector.shape_cast %100 : vector<1x32x16xf32> to vector<32x16xf32>
    %cst_105 = arith.constant dense<0.000000e+00> : vector<4x16xf32>
    %102 = tpu.matmul %99, %101, %cst_105 {dimension_numbers = #tpu.dot_dimension_numbers<[1], [0], [0], [1], [0, 0, 1, 1], [], []>} : vector<4x32xf32>, vector<32x16xf32>, vector<4x16xf32> -> vector<4x16xf32>
    %103 = arith.addf %98, %102 : vector<4x16xf32>
    %c4_106 = arith.constant 4 : index
    %c0_107 = arith.constant 0 : index
    %104 = vector.load %arg8[%c4_106, %c0_107] : memref<10x32xf32, #tpu.memory_space<vmem>>, vector<4x32xf32>
    %c4_108 = arith.constant 4 : index
    %c0_109 = arith.constant 0 : index
    %c0_110 = arith.constant 0 : index
    %105 = vector.load %arg3[%c4_108, %c0_109, %c0_110] : memref<7x32x16xf32, #tpu.memory_space<vmem>>, vector<1x32x16xf32>
    %106 = vector.shape_cast %105 : vector<1x32x16xf32> to vector<32x16xf32>
    %cst_111 = arith.constant dense<0.000000e+00> : vector<4x16xf32>
    %107 = tpu.matmul %104, %106, %cst_111 {dimension_numbers = #tpu.dot_dimension_numbers<[1], [0], [0], [1], [0, 0, 1, 1], [], []>} : vector<4x32xf32>, vector<32x16xf32>, vector<4x16xf32> -> vector<4x16xf32>
    %108 = arith.addf %103, %107 : vector<4x16xf32>
    %c5_112 = arith.constant 5 : index
    %c0_113 = arith.constant 0 : index
    %109 = vector.load %arg8[%c5_112, %c0_113] : memref<10x32xf32, #tpu.memory_space<vmem>>, vector<4x32xf32>
    %c5_114 = arith.constant 5 : index
    %c0_115 = arith.constant 0 : index
    %c0_116 = arith.constant 0 : index
    %110 = vector.load %arg3[%c5_114, %c0_115, %c0_116] : memref<7x32x16xf32, #tpu.memory_space<vmem>>, vector<1x32x16xf32>
    %111 = vector.shape_cast %110 : vector<1x32x16xf32> to vector<32x16xf32>
    %cst_117 = arith.constant dense<0.000000e+00> : vector<4x16xf32>
    %112 = tpu.matmul %109, %111, %cst_117 {dimension_numbers = #tpu.dot_dimension_numbers<[1], [0], [0], [1], [0, 0, 1, 1], [], []>} : vector<4x32xf32>, vector<32x16xf32>, vector<4x16xf32> -> vector<4x16xf32>
    %113 = arith.addf %108, %112 : vector<4x16xf32>
    %c6_118 = arith.constant 6 : index
    %c0_119 = arith.constant 0 : index
    %114 = vector.load %arg8[%c6_118, %c0_119] : memref<10x32xf32, #tpu.memory_space<vmem>>, vector<4x32xf32>
    %c6_120 = arith.constant 6 : index
    %c0_121 = arith.constant 0 : index
    %c0_122 = arith.constant 0 : index
    %115 = vector.load %arg3[%c6_120, %c0_121, %c0_122] : memref<7x32x16xf32, #tpu.memory_space<vmem>>, vector<1x32x16xf32>
    %116 = vector.shape_cast %115 : vector<1x32x16xf32> to vector<32x16xf32>
    %cst_123 = arith.constant dense<0.000000e+00> : vector<4x16xf32>
    %117 = tpu.matmul %114, %116, %cst_123 {dimension_numbers = #tpu.dot_dimension_numbers<[1], [0], [0], [1], [0, 0, 1, 1], [], []>} : vector<4x32xf32>, vector<32x16xf32>, vector<4x16xf32> -> vector<4x16xf32>
    %118 = arith.addf %113, %117 : vector<4x16xf32>
    %119 = vector.broadcast %82 : f32 to vector<4x16xf32>
    %120 = arith.addf %118, %119 : vector<4x16xf32>
    %121 = arith.negf %120 : vector<4x16xf32>
    %122 = math.exp %121 : vector<4x16xf32>
    %cst_124 = arith.constant 1.000000e+00 : f32
    %123 = vector.broadcast %cst_124 : f32 to vector<4x16xf32>
    %124 = arith.addf %123, %122 : vector<4x16xf32>
    %125 = arith.divf %123, %124 : vector<4x16xf32>
    %cst_125 = arith.constant 0.333333343 : f32
    %126 = vector.broadcast %cst_125 : f32 to vector<4x16xf32>
    %127 = arith.mulf %125, %126 : vector<4x16xf32>
    %c0_126 = arith.constant 0 : index
    %c0_127 = arith.constant 0 : index
    %128 = vector.load %arg10[%c0_126, %c0_127] : memref<4x16xf32, #tpu.memory_space<vmem>>, vector<4x16xf32>
    tpu.vector_store %arg10[%c0_126, %c0_127], %127 {strides = array<i32>} : memref<4x16xf32, #tpu.memory_space<vmem>>, vector<4x16xf32>,
    %c2_128 = arith.constant 2 : index
    %129 = memref.load %arg1[%c2_128] : memref<3xf32, #tpu.memory_space<smem>>
    %cst_129 = arith.constant 0.000000e+00 : f32
    %130 = vector.broadcast %cst_129 : f32 to vector<4x16xf32>
    %c0_130 = arith.constant 0 : index
    %c0_131 = arith.constant 0 : index
    %131 = vector.load %arg9[%c0_130, %c0_131] : memref<10x32xf32, #tpu.memory_space<vmem>>, vector<4x32xf32>
    %c0_132 = arith.constant 0 : index
    %c0_133 = arith.constant 0 : index
    %c0_134 = arith.constant 0 : index
    %132 = vector.load %arg4[%c0_132, %c0_133, %c0_134] : memref<7x32x16xf32, #tpu.memory_space<vmem>>, vector<1x32x16xf32>
    %133 = vector.shape_cast %132 : vector<1x32x16xf32> to vector<32x16xf32>
    %cst_135 = arith.constant dense<0.000000e+00> : vector<4x16xf32>
    %134 = tpu.matmul %131, %133, %cst_135 {dimension_numbers = #tpu.dot_dimension_numbers<[1], [0], [0], [1], [0, 0, 1, 1], [], []>} : vector<4x32xf32>, vector<32x16xf32>, vector<4x16xf32> -> vector<4x16xf32>
    %135 = arith.addf %130, %134 : vector<4x16xf32>
    %c1_136 = arith.constant 1 : index
    %c0_137 = arith.constant 0 : index
    %136 = vector.load %arg9[%c1_136, %c0_137] : memref<10x32xf32, #tpu.memory_space<vmem>>, vector<4x32xf32>
    %c1_138 = arith.constant 1 : index
    %c0_139 = arith.constant 0 : index
    %c0_140 = arith.constant 0 : index
    %137 = vector.load %arg4[%c1_138, %c0_139, %c0_140] : memref<7x32x16xf32, #tpu.memory_space<vmem>>, vector<1x32x16xf32>
    %138 = vector.shape_cast %137 : vector<1x32x16xf32> to vector<32x16xf32>
    %cst_141 = arith.constant dense<0.000000e+00> : vector<4x16xf32>
    %139 = tpu.matmul %136, %138, %cst_141 {dimension_numbers = #tpu.dot_dimension_numbers<[1], [0], [0], [1], [0, 0, 1, 1], [], []>} : vector<4x32xf32>, vector<32x16xf32>, vector<4x16xf32> -> vector<4x16xf32>
    %140 = arith.addf %135, %139 : vector<4x16xf32>
    %c2_142 = arith.constant 2 : index
    %c0_143 = arith.constant 0 : index
    %141 = vector.load %arg9[%c2_142, %c0_143] : memref<10x32xf32, #tpu.memory_space<vmem>>, vector<4x32xf32>
    %c2_144 = arith.constant 2 : index
    %c0_145 = arith.constant 0 : index
    %c0_146 = arith.constant 0 : index
    %142 = vector.load %arg4[%c2_144, %c0_145, %c0_146] : memref<7x32x16xf32, #tpu.memory_space<vmem>>, vector<1x32x16xf32>
    %143 = vector.shape_cast %142 : vector<1x32x16xf32> to vector<32x16xf32>
    %cst_147 = arith.constant dense<0.000000e+00> : vector<4x16xf32>
    %144 = tpu.matmul %141, %143, %cst_147 {dimension_numbers = #tpu.dot_dimension_numbers<[1], [0], [0], [1], [0, 0, 1, 1], [], []>} : vector<4x32xf32>, vector<32x16xf32>, vector<4x16xf32> -> vector<4x16xf32>
    %145 = arith.addf %140, %144 : vector<4x16xf32>
    %c3_148 = arith.constant 3 : index
    %c0_149 = arith.constant 0 : index
    %146 = vector.load %arg9[%c3_148, %c0_149] : memref<10x32xf32, #tpu.memory_space<vmem>>, vector<4x32xf32>
    %c3_150 = arith.constant 3 : index
    %c0_151 = arith.constant 0 : index
    %c0_152 = arith.constant 0 : index
    %147 = vector.load %arg4[%c3_150, %c0_151, %c0_152] : memref<7x32x16xf32, #tpu.memory_space<vmem>>, vector<1x32x16xf32>
    %148 = vector.shape_cast %147 : vector<1x32x16xf32> to vector<32x16xf32>
    %cst_153 = arith.constant dense<0.000000e+00> : vector<4x16xf32>
    %149 = tpu.matmul %146, %148, %cst_153 {dimension_numbers = #tpu.dot_dimension_numbers<[1], [0], [0], [1], [0, 0, 1, 1], [], []>} : vector<4x32xf32>, vector<32x16xf32>, vector<4x16xf32> -> vector<4x16xf32>
    %150 = arith.addf %145, %149 : vector<4x16xf32>
    %c4_154 = arith.constant 4 : index
    %c0_155 = arith.constant 0 : index
    %151 = vector.load %arg9[%c4_154, %c0_155] : memref<10x32xf32, #tpu.memory_space<vmem>>, vector<4x32xf32>
    %c4_156 = arith.constant 4 : index
    %c0_157 = arith.constant 0 : index
    %c0_158 = arith.constant 0 : index
    %152 = vector.load %arg4[%c4_156, %c0_157, %c0_158] : memref<7x32x16xf32, #tpu.memory_space<vmem>>, vector<1x32x16xf32>
    %153 = vector.shape_cast %152 : vector<1x32x16xf32> to vector<32x16xf32>
    %cst_159 = arith.constant dense<0.000000e+00> : vector<4x16xf32>
    %154 = tpu.matmul %151, %153, %cst_159 {dimension_numbers = #tpu.dot_dimension_numbers<[1], [0], [0], [1], [0, 0, 1, 1], [], []>} : vector<4x32xf32>, vector<32x16xf32>, vector<4x16xf32> -> vector<4x16xf32>
    %155 = arith.addf %150, %154 : vector<4x16xf32>
    %c5_160 = arith.constant 5 : index
    %c0_161 = arith.constant 0 : index
    %156 = vector.load %arg9[%c5_160, %c0_161] : memref<10x32xf32, #tpu.memory_space<vmem>>, vector<4x32xf32>
    %c5_162 = arith.constant 5 : index
    %c0_163 = arith.constant 0 : index
    %c0_164 = arith.constant 0 : index
    %157 = vector.load %arg4[%c5_162, %c0_163, %c0_164] : memref<7x32x16xf32, #tpu.memory_space<vmem>>, vector<1x32x16xf32>
    %158 = vector.shape_cast %157 : vector<1x32x16xf32> to vector<32x16xf32>
    %cst_165 = arith.constant dense<0.000000e+00> : vector<4x16xf32>
    %159 = tpu.matmul %156, %158, %cst_165 {dimension_numbers = #tpu.dot_dimension_numbers<[1], [0], [0], [1], [0, 0, 1, 1], [], []>} : vector<4x32xf32>, vector<32x16xf32>, vector<4x16xf32> -> vector<4x16xf32>
    %160 = arith.addf %155, %159 : vector<4x16xf32>
    %c6_166 = arith.constant 6 : index
    %c0_167 = arith.constant 0 : index
    %161 = vector.load %arg9[%c6_166, %c0_167] : memref<10x32xf32, #tpu.memory_space<vmem>>, vector<4x32xf32>
    %c6_168 = arith.constant 6 : index
    %c0_169 = arith.constant 0 : index
    %c0_170 = arith.constant 0 : index
    %162 = vector.load %arg4[%c6_168, %c0_169, %c0_170] : memref<7x32x16xf32, #tpu.memory_space<vmem>>, vector<1x32x16xf32>
    %163 = vector.shape_cast %162 : vector<1x32x16xf32> to vector<32x16xf32>
    %cst_171 = arith.constant dense<0.000000e+00> : vector<4x16xf32>
    %164 = tpu.matmul %161, %163, %cst_171 {dimension_numbers = #tpu.dot_dimension_numbers<[1], [0], [0], [1], [0, 0, 1, 1], [], []>} : vector<4x32xf32>, vector<32x16xf32>, vector<4x16xf32> -> vector<4x16xf32>
    %165 = arith.addf %160, %164 : vector<4x16xf32>
    %166 = vector.broadcast %129 : f32 to vector<4x16xf32>
    %167 = arith.addf %165, %166 : vector<4x16xf32>
    %168 = arith.negf %167 : vector<4x16xf32>
    %169 = math.exp %168 : vector<4x16xf32>
    %cst_172 = arith.constant 1.000000e+00 : f32
    %170 = vector.broadcast %cst_172 : f32 to vector<4x16xf32>
    %171 = arith.addf %170, %169 : vector<4x16xf32>
    %172 = arith.divf %170, %171 : vector<4x16xf32>
    %cst_173 = arith.constant 0.333333343 : f32
    %173 = vector.broadcast %cst_173 : f32 to vector<4x16xf32>
    %174 = arith.mulf %172, %173 : vector<4x16xf32>
    %c0_174 = arith.constant 0 : index
    %c0_175 = arith.constant 0 : index
    %175 = vector.load %arg11[%c0_174, %c0_175] : memref<4x16xf32, #tpu.memory_space<vmem>>, vector<4x16xf32>
    tpu.vector_store %arg11[%c0_174, %c0_175], %174 {strides = array<i32>} : memref<4x16xf32, #tpu.memory_space<vmem>>, vector<4x16xf32>,
    %c0_176 = arith.constant 0 : index
    %c0_177 = arith.constant 0 : index
    %c0_178 = arith.constant 0 : index
    %c0_179 = arith.constant 0 : index
    %176 = vector.load %arg5[%c0_176, %c0_177, %c0_178, %c0_179] : memref<1x4x16x16xf32, #tpu.memory_space<vmem>>, vector<1x4x16x16xf32>
    %177 = vector.shape_cast %176 : vector<1x4x16x16xf32> to vector<4x16x16xf32>
    %c0_180 = arith.constant 0 : index
    %c0_181 = arith.constant 0 : index
    %178 = vector.load %arg10[%c0_180, %c0_181] : memref<4x16xf32, #tpu.memory_space<vmem>>, vector<4x16xf32>
    %c0_182 = arith.constant 0 : index
    %c0_183 = arith.constant 0 : index
    %179 = vector.load %arg11[%c0_182, %c0_183] : memref<4x16xf32, #tpu.memory_space<vmem>>, vector<4x16xf32>
    %180 = vector.shape_cast %81 : vector<16x16xf32> to vector<1x16x16xf32>
    %181 = vector.shape_cast %178 : vector<4x16xf32> to vector<4x1x16xf32>
    %182 = vector.broadcast %180 : vector<1x16x16xf32> to vector<4x16x16xf32>
    %183 = vector.broadcast %181 : vector<4x1x16xf32> to vector<4x16x16xf32>
    %184 = arith.addf %182, %183 : vector<4x16x16xf32>
    %185 = vector.shape_cast %179 : vector<4x16xf32> to vector<4x16x1xf32>
    %186 = vector.broadcast %185 : vector<4x16x1xf32> to vector<4x16x16xf32>
    %187 = arith.addf %184, %186 : vector<4x16x16xf32>
    %188 = arith.mulf %177, %187 : vector<4x16x16xf32>
    %c0_184 = arith.constant 0 : index
    %c0_185 = arith.constant 0 : index
    %c0_186 = arith.constant 0 : index
    %c0_187 = arith.constant 0 : index
    %189 = vector.load %arg6[%c0_184, %c0_185, %c0_186, %c0_187] : memref<1x4x16x16xf32, #tpu.memory_space<vmem>>, vector<1x4x16x16xf32>
    %190 = vector.shape_cast %189 : vector<1x4x16x16xf32> to vector<4x16x16xf32>
    %191 = vector.shape_cast %188 : vector<4x16x16xf32> to vector<1x4x16x16xf32>
    tpu.vector_store %arg6[%c0_184, %c0_185, %c0_186, %c0_187], %191 {strides = array<i32>} : memref<1x4x16x16xf32, #tpu.memory_space<vmem>>, vector<1x4x16x16xf32>,
    return
  }
  func.func @transform_0(%arg0: i32) -> i32 {
    %c0_i32 = arith.constant 0 : i32
    %c0_i32_0 = arith.constant 0 : i32
    return %c0_i32 : i32
  }
  func.func @transform_1(%arg0: i32) -> (i32, i32, i32) {
    %c0_i32 = arith.constant 0 : i32
    %c0_i32_0 = arith.constant 0 : i32
    %c0_i32_1 = arith.constant 0 : i32
    %c0_i32_2 = arith.constant 0 : i32
    return %c0_i32, %c0_i32_0, %c0_i32_1 : i32, i32, i32
  }
  func.func @transform_2(%arg0: i32) -> (i32, i32, i32) {
    %c0_i32 = arith.constant 0 : i32
    %c0_i32_0 = arith.constant 0 : i32
    %c0_i32_1 = arith.constant 0 : i32
    %c0_i32_2 = arith.constant 0 : i32
    return %c0_i32, %c0_i32_0, %c0_i32_1 : i32, i32, i32
  }
  func.func @transform_3(%arg0: i32) -> (i32, i32, i32) {
    %c0_i32 = arith.constant 0 : i32
    %c0_i32_0 = arith.constant 0 : i32
    %c0_i32_1 = arith.constant 0 : i32
    %c0_i32_2 = arith.constant 0 : i32
    return %c0_i32, %c0_i32_0, %c0_i32_1 : i32, i32, i32
  }
  func.func @transform_4(%arg0: i32) -> (i32, i32, i32, i32) {
    %c0_i32 = arith.constant 0 : i32
    %c0_i32_0 = arith.constant 0 : i32
    %c0_i32_1 = arith.constant 0 : i32
    %c0_i32_2 = arith.constant 0 : i32
    return %arg0, %c0_i32, %c0_i32_0, %c0_i32_1 : i32, i32, i32, i32
  }
  func.func @transform_5(%arg0: i32) -> (i32, i32, i32, i32) {
    %c0_i32 = arith.constant 0 : i32
    %c0_i32_0 = arith.constant 0 : i32
    %c0_i32_1 = arith.constant 0 : i32
    %c0_i32_2 = arith.constant 0 : i32
    return %arg0, %c0_i32, %c0_i32_0, %c0_i32_1 : i32, i32, i32, i32
  }
}

</mosaic_0001>

<bundles_post_ra>
// kernel: tpu_custom_call.1
= control target key start
LH: loop header
LB: loop body
LE: loop exit
PB: predicated region body
PF: predicated region fallthrough
CT: control target
= control target key end

     0   :  { %10 = vsyncpa [#allocation9], 0  ;;  %s3998_s0 = inlined_call_operand.vmem [shape: f32[3], index: 0, kind: input, shape index: {}]   ;;  %s3999_s1 = inlined_call_operand.vmem [shape: f32[7,32,16], index: 1, kind: input, shape index: {}]   ;;  %s4000_s2 = inlined_call_operand.vmem [shape: f32[7,32,16], index: 2, kind: input, shape index: {}]   ;;  %s4001_s3 = inlined_call_operand.vmem [shape: f32[7,32,16], index: 3, kind: input, shape index: {}]   ;;  %s4002_s4 = inlined_call_operand.vmem [shape: f32[2,4,16,16], index: 4, kind: input, shape index: {}]   ;;  %s4003_s5 = inlined_call_operand.hbm [shape: f32[2,4,16,16], index: 5, kind: output, shape index: {}]  }
   0x1   :  { %11 = vsyncpa [#allocation8], 0 }
   0x2   :  { %13 = vsyncpa [#allocation8 + $0x1], 0  ;;  %s3340_s18 = smov 0   ;;  %s3342_s19 = smov 0  }
   0x3   :  { %s3344_s20 = smov 0   ;;  %s3346_s21 = smov 0  }
   0x4 LB: > { %s3361_s22 = sadd.s32 4294967295, %s3299_s21   ;;  %s2527_s23 = sadd.s32 4294967294, %s3299_s21   ;;  %s3299_s21 = sphi %s3346_s21, %s4010_s21   ;;  %s3295_s20 = sphi %s3344_s20, %s4009_s20   ;;  %s3291_s19 = sphi %s3342_s19, %s4008_s19   ;;  %s3287_s18 = sphi %s3340_s18, %s4007_s18  }
   0x5   : > { %s3365_s24 = sadd.s32 1, %s3299_s21   ;;  %s136_s25 = sadd.s32 1, %s3295_s20 }
   0x6   : > { %s133_s26 = ssub.s32 %s3299_s21, %s3365_s24  ;;  %p146_p0 = scmp.ne.s32.totalorder %s3295_s20, %s3291_s19 }
   0x7   : > { %p134_p1 = scmp.eq.s32.totalorder %s133_s26, 0  ;;  %p147_p2 = scmp.eq.s32.totalorder %s3361_s22, 1 }
   0x8   : > { %p152_p3 = scmp.ne.s32.totalorder %s3291_s19, %s3287_s18  ;;  %p153_p4 = scmp.eq.s32.totalorder %s2527_s23, 1 }
   0x9   : > { %s3376_s27 = scalar_select %p134_p1, %s3295_s20, %s136_s25  }
   0xa   : > { %p3378_p5 = por %p147_p2, %p146_p0  ;;  %p3382_p6 = por %p153_p4, %p152_p3 }
   0xb   : > { %p2528_p7 = scmp.ge.s32.totalorder %s3299_s21, 1  ;;  %p160_p8 = scmp.lt.s32.totalorder %s3299_s21, 3 }
   0xc   : > { %p3159_p9 = scmp.eq.s32.totalorder %s3361_s22, 0  ;;  %s173_s8 = sshll.u32 %s3998_s0, 4  ;;  %s174_s8 = int_to_ptr.vmem [resolvable:$true] %s173_s8 }
   0xd   : > { %p3389_p10 = pnand %p2528_p7, %p160_p8  ;;  %s3218_s9 = scalar_lea.vmem %s174_s8, 16 }
   0xe   : > { %p3219_p13 = scmp.ne.s32.totalorder %s174_s8, %s3218_s9  ;;  %p3226_p3 = scmp.lt.s32.totalorder %s174_s8, %s174_s8 }
   0xf   : > { %p3151_p11 = pneg %p3389_p10  ;;  %p3227_p4 = scmp.lt.s32.totalorder %s3218_s9, %s3218_s9 }
  0x11   : > { %p3152_p12 = pnand %p3159_p9, %p3151_p11  ;;  %p3228_p7 = por %p3227_p4, %p3226_p3 }
  0x13   : > { %p3220_p0 = pneg %p3152_p12 }
  0x15   : > { %p3221_p1 = pnand %p3220_p0, %p3219_p13 }
  0x17   : > { %p3222_p2 = pneg %p3221_p1 }
  0x19   : > { %p3229_p8 = pnand %p3228_p7, %p3222_p2 }
  0x1b   : > { %3232 = shalt.err (!%p3229_p8)
}
  0x1c   : > { %s3301_s10 = smov [#allocation7]   ;;  %203 = sbr.rel (%p3389_p10) target bundleno = 709 (0x2c5), region = 40 }
  0x1d   : > { %3154 = dma.vmem_to_smem (!%p3152_p12), %s174_s8, 16, %s3301_s10, [#allocation9]  }
  0x23   : > { %3278 = dma.done.wait (%p3159_p9), [#allocation9], 16  }
  0x24   : > { %3280 = vsyncadd (%p3159_p9), [#allocation9], 4294967280 }
  0x25   : > { %209 = sfence }
  0x26   : > { %p232_p11 = scmp.lt.s32.totalorder %s3361_s22, 1  ;;  %vm252_vm0 = vcmask 130048   ;;  %v2536_v0 = vld [vmem:[%s3999_s1 + $0x20] sm:$0xff]  ;;  %v2537_v1 = vld [vmem:[%s3999_s1 + $0x28] sm:$0xff]  ;;  %vm237_vm1 = vcmask 256000   ;;  %v3302_v12 = vmov 0.0  }
  0x27   : > { %v2993_v5 = vpack.c.bf16 %v2537_v1, %v2536_v0  ;;  %238 = vst.msk [vmem:[#allocation2] sm:$0x7] %vm237_vm1, %v3302_v12  ;;  %239 = vst.msk [vmem:[#allocation2 + $0x13] sm:$0x7] %vm237_vm1, %v3302_v12  ;;  %vm315_vm2 = vcmask 1041409   ;;  %vm317_vm3 = vcmask 1042434  }
  0x28   : > { %s233_s11 = scalar_select %p232_p11, %s3361_s22, 1  ;;  %240 = vst.msk [vmem:[#allocation3] sm:$0x7] %vm237_vm1, %v3302_v12  ;;  %241 = vst.msk [vmem:[#allocation3 + $0x7] sm:$0x7] %vm237_vm1, %v3302_v12  ;;  %vm319_vm4 = vcmask 1043459  }
  0x29   : > { %242 = vst.msk [vmem:[#allocation4] sm:$0x7] %vm237_vm1, %v3302_v12  ;;  %243 = vst.msk [vmem:[#allocation4 + $0x7] sm:$0x7] %vm237_vm1, %v3302_v12  ;;  %2994 = vmatprep.subr.bf16.mxu0 %v2993_v5  ;;  %s3303_s26 = smov 16   ;;  %vm3305_vm5 = vmmov 0  }
  0x2a   : > { %s2648_s12 = sshll.u32 %s233_s11, 6  ;;  %2996 = vmatpush3.bf16.msra.mxu0 %v2993_v5  ;;  %2847 = vmatprep.mubr.msk.f32.mxu1 %vm3305_vm5, %v3302_v12  ;;  %vm322_vm6 = vcmask 125952   ;;  %vm525_vm7 = vcmask 261248   ;;  %vm542_vm8 = vcmask 261120   ;;  %vm366_vm9 = vcmask 257152   ;;  %s2576_s30 = sld [smem:[#allocation7 + $0x1]] }
  0x2b   : > { %s3411_s15 = scalar_lea.vmem %s4002_s4, %s2648_s12  ;;  %vm403_vm10 = vcmask 130112   ;;  %vm479_vm11 = vcmask 261312   ;;  %s2609_s6 = sld [smem:[#allocation7 + $0x2]] }
  0x2c   : > { %v244_v2 = vld [vmem:[%s3411_s15] sm:$0xff]  ;;  %v245_v3 = vld [vmem:[%s3411_s15 + $0x8] sm:$0xff]  ;;  %v246_v4 = vld [vmem:[%s3411_s15 + $0x10] sm:$0xff]  ;;  %s229_s7 = sand.u32 1, %s3291_s19   ;;  %s2649_s10 = sshll.u32 %s3361_s22, 10 }
  0x2d   : > { %v247_v6 = vld [vmem:[%s3411_s15 + $0x18] sm:$0xff]  ;;  %v3424_v7 = vld [vmem:[%s3411_s15 + $0x20] sm:$0xff]  ;;  %v249_v8 = vld [vmem:[%s3411_s15 + $0x28] sm:$0xff]  ;;  %v3428_v9 = vsel %vm252_vm0, %v244_v2, 0.0  ;;  %v3431_v10 = vsel %vm252_vm0, %v246_v4, 0.0  ;;  %v3434_v11 = vsel %vm252_vm0, %v245_v3, 0.0  ;;  %s3947_s14 = scalar_lea.hbm %s4003_s5, %s2649_s10 }
  0x2e   : > { %v3443_v13 = vld [vmem:[%s3411_s15 + $0x30] sm:$0xff]  ;;  %v3446_v14 = vld [vmem:[%s3411_s15 + $0x38] sm:$0xff]  ;;  %v269_v15 = vadd.f32 %v3431_v10, %v3428_v9  ;;  %v3452_v16 = vsel %vm252_vm0, %v3424_v7, 0.0  ;;  %v3455_v17 = vsel %vm252_vm0, %v247_v6, 0.0  ;;  %v3458_v18 = vsel %vm252_vm0, %v249_v8, 0.0  ;;  %s2533_s8 = sshll.u32 %s229_s7, 6 }
  0x2f   : > { %v3462_v19 = vsel %vm252_vm0, %v3443_v13, 0.0  ;;  %v3466_v20 = vsel %vm252_vm0, %v3446_v14, 0.0  ;;  %v324_v21 = vadd.f32 %v3434_v11, %v3428_v9  ;;  %v331_v22 = vadd.f32 %v3455_v17, %v3431_v10  ;;  %s3923_s9 = scalar_lea.vmem [#allocation10], %s2533_s8  ;;  %s3957_s22 = scalar_lea.sflag [#allocation8], %s229_s7 }
  0x30   : > { %v271_v23 = vadd.f32 %v3452_v16, %v269_v15  ;;  %v338_v24 = vadd.f32 %v3458_v18, %v3452_v16  ;;  %v345_v25 = vadd.f32 %v3466_v20, %v3462_v19  ;;  %v276_v26 = vadd.f32 %v3455_v17, %v3434_v11  ;;  %s2453_s11 = sshll.u32 %s3923_s9, 4  ;;  %s3307_s16 = smov [#allocation10]   ;;  %s3949_s11 = int_to_ptr.vmem [resolvable:$true] %s2453_s11 }
  0x31   : > { %v325_v27 = vrot.slane %v324_v21, 4  ;;  %v332_v28 = vrot.slane %v331_v22, 4  ;;  %v3480_v29 = vsel %vm252_vm0, %v245_v3, -inf  ;;  %v3483_v30 = vsel %vm252_vm0, %v244_v2, -inf  ;;  %s3237_s17 = sshll.u32 %s3307_s16, 4  ;;  %s3238_s17 = int_to_ptr.vmem [resolvable:$false] %s3237_s17 }
  0x32   : > { %v273_v31 = vadd.f32 %v3462_v19, %v271_v23  ;;  %v339_v32 = vrot.slane %v338_v24, 4  ;;  %v346_v33 = vrot.slane %v345_v25, 4  ;;  %v278_v34 = vadd.f32 %v3458_v18, %v276_v26  ;;  %s3239_s23 = scalar_lea.vmem %s3238_s17, 2048  ;;  %p3240_p13 = scmp.lt.s32.totalorder %s3949_s11, %s3238_s17 }
  0x33   : > { %v326_v35 = vadd.f32 %v325_v27, %v324_v21  ;;  %v333_v36 = vadd.f32 %v332_v28, %v331_v22  ;;  %v283_v37 = vmax.f32 %v3483_v30, %v3480_v29  ;;  %v3490_v38 = vsel %vm252_vm0, %v247_v6, -inf }
  0x34   : > { %v340_v39 = vadd.f32 %v339_v32, %v338_v24  ;;  %v347_v40 = vadd.f32 %v346_v33, %v345_v25  ;;  %v515_v41 = vmul.f32 0.25, %v273_v31  ;;  %v280_v42 = vadd.f32 %v3466_v20, %v278_v34  ;;  %v2538_v31 = vld [vmem:[%s3999_s1 + $0x30] sm:$0xff]  ;;  %v2539_v32 = vld [vmem:[%s3999_s1 + $0x38] sm:$0xff] }
  0x35   : > { %v327_v43 = vrot.slane %v326_v35, 2  ;;  %v334_v44 = vrot.slane %v333_v36, 2  ;;  %v284_v45 = vrot.slane %v283_v37, 4  ;;  %v3494_v46 = vsel %vm252_vm0, %v246_v4, -inf }
  0x36   : > { %519 = vrot.lane.b32.xlu0 %v515_v41, %s3303_s26  ;;  %v516_v47 = vmul.f32 0.25, %v280_v42  ;;  %v341_v48 = vrot.slane %v340_v39, 2  ;;  %v348_v49 = vrot.slane %v347_v40, 2  ;;  %v290_v50 = vmax.f32 %v3494_v46, %v3490_v38  ;;  %v2577_v41 = vld [vmem:[%s4000_s2 + $0x20] sm:$0xff] }
  0x37   : > { %v328_v51 = vadd.f32 %v327_v43, %v326_v35  ;;  %v335_v52 = vadd.f32 %v334_v44, %v333_v36  ;;  %v285_v53 = vmax.f32 %v283_v37, %v284_v45  ;;  %v3500_v57 = vsel %vm252_vm0, %v249_v8, -inf }
  0x38   : > { %v342_v54 = vadd.f32 %v341_v48, %v340_v39  ;;  %v349_v55 = vadd.f32 %v348_v49, %v347_v40  ;;  %v291_v56 = vrot.slane %v290_v50, 4  ;;  %v3504_v61 = vsel %vm252_vm0, %v3424_v7, -inf  ;;  %v532_v48 = vld [vmem:[%s3999_s1 + $0x8] sm:$0xff] }
  0x39   : > { %v329_v58 = vrot.slane %v328_v51, 1  ;;  %v336_v59 = vrot.slane %v335_v52, 1  ;;  %v286_v60 = vrot.slane %v285_v53, 2  ;;  %v297_v1 = vmax.f32 %v3504_v61, %v3500_v57 }
  0x3a   : > { %521 = vrot.lane.b32.xlu0 %v516_v47, %s3303_s26  ;;  %v343_v62 = vrot.slane %v342_v54, 1  ;;  %v350_v63 = vrot.slane %v349_v55, 1  ;;  %v292_v0 = vmax.f32 %v290_v50, %v291_v56  ;;  %v263_v5 = vmax.f32 %v3480_v29, %v3500_v57  ;;  %v531_v47 = vld [vmem:[%s3999_s1] sm:$0xff] }
  0x3b   : > { %v330_v2 = vadd.f32 %v329_v58, %v328_v51  ;;  %v337_v3 = vadd.f32 %v336_v59, %v335_v52  ;;  %v287_v4 = vmax.f32 %v285_v53, %v286_v60  ;;  %v298_v21 = vrot.slane %v297_v1, 4  ;;  %v2579_v53 = vld [vmem:[%s4000_s2 + $0x30] sm:$0xff] }
  0x3c   : > { %v344_v6 = vadd.f32 %v343_v62, %v342_v54  ;;  %v351_v8 = vadd.f32 %v350_v63, %v349_v55  ;;  %v293_v15 = vrot.slane %v292_v0, 2  ;;  %v256_v23 = vmax.f32 %v3483_v30, %v3504_v61  ;;  %v2580_v54 = vld [vmem:[%s4000_s2 + $0x38] sm:$0xff] }
  0x3d   : > { %v352_v7 = vmul.f32 0.0625, %v330_v2  ;;  %v353_v22 = vmul.f32 0.0625, %v337_v3  ;;  %v3515_v24 = vsel %vm252_vm0, %v3446_v14, -inf  ;;  %v299_v28 = vmax.f32 %v297_v1, %v298_v21  ;;  %v2547_v21 = vld [vmem:[%s3999_s1 + $0x58] sm:$0xff] }
  0x3e   : > { %v354_v25 = vmul.f32 0.0625, %v344_v6  ;;  %v355_v26 = vmul.f32 0.0625, %v351_v8  ;;  %v294_v27 = vmax.f32 %v292_v0, %v293_v15  ;;  %v288_v34 = vrot.slane %v287_v4, 1  ;;  %v2546_v15 = vld [vmem:[%s3999_s1 + $0x50] sm:$0xff] }
  0x3f   : > { %v360_v33 = vsel %vm315_vm2, %v353_v22, %v352_v7  ;;  %v265_v35 = vmax.f32 %v3490_v38, %v3515_v24  ;;  %v257_v14 = vsel %vm252_vm0, %v3443_v13, -inf  ;;  %v300_v39 = vrot.slane %v299_v28, 2  ;;  %v2578_v13 = vld [vmem:[%s4000_s2 + $0x28] sm:$0xff] }
  0x40   : > { %v361_v36 = vsel %vm317_vm3, %v354_v25, %v360_v33  ;;  %v295_v37 = vrot.slane %v294_v27, 1  ;;  %v258_v40 = vmax.f32 %v3494_v46, %v257_v14  ;;  %v304_v43 = vmax.f32 %v257_v14, %v3515_v24  ;;  %v2550_v25 = vld [vmem:[%s3999_s1 + $0x60] sm:$0xff] }
  0x41   : > { %v362_v42 = vsel %vm319_vm4, %v355_v26, %v361_v36  ;;  %v266_v44 = vmax.f32 %v263_v5, %v265_v35  ;;  %v2997_v45 = vpack.c.bf16 %v2539_v32, %v2538_v31  ;;  %v301_v49 = vmax.f32 %v299_v28, %v300_v39  ;;  %v2551_v31 = vld [vmem:[%s3999_s1 + $0x68] sm:$0xff]  ;;  %v2583_v33 = vld [vmem:[%s4000_s2 + $0x40] sm:$0xff]  ;;  %v2553_v36 = vld [vmem:[%s3999_s1 + $0x78] sm:$0xff] }
  0x42   : > { %363 = vrot.lane.b32.xlu1 %v362_v42, %s3303_s26  ;;  %v259_v50 = vmax.f32 %v256_v23, %v258_v40  ;;  %v305_v51 = vrot.slane %v304_v43, 4  ;;  %v3304_v52 = vmov 0.0|0.0   ;;  %v3050_v56 = vpack.c.bf16 %v2578_v13, %v2577_v41  ;;  %v1176_v23 = vld [vmem:[%s4000_s2 + $0x10] sm:$0xff]  ;;  %v2586_v40 = vld [vmem:[%s4000_s2 + $0x58] sm:$0xff]  ;;  %v2556_v41 = vld [vmem:[%s3999_s1 + $0x80] sm:$0xff]  ;;  %s528_s26 = sld [smem:[#allocation7]] }
  0x43   : > { %514 = vst.msk [vmem:[#allocation2 + $0xb] sm:$0xff] %vm252_vm0, %v266_v44  ;;  %2998 = vmatprep.subr.bf16.mxu0 %v2997_v45  ;;  %3049 = vmatprep.subr.bf16.mxu1 %v3304_v52  ;;  %v302_v55 = vrot.slane %v301_v49, 1  ;;  %v3001_v58 = vpack.c.bf16 %v532_v48, %v531_v47  ;;  %v289_v59 = vmax.f32 %v287_v4, %v288_v34  ;;  %v2584_v34 = vld [vmem:[%s4000_s2 + $0x48] sm:$0xff]  ;;  %v2585_v39 = vld [vmem:[%s4000_s2 + $0x50] sm:$0xff]  ;;  %v2588_v48 = vld [vmem:[%s4000_s2 + $0x60] sm:$0xff] }
  0x44   : > { %513 = vst.msk [vmem:[#allocation2 + $0x3] sm:$0xff] %vm252_vm0, %v259_v50  ;;  %3000 = vmatpush3.bf16.msra.mxu0 %v2997_v45  ;;  %v296_v60 = vmax.f32 %v294_v27, %v295_v37  ;;  %v306_v62 = vmax.f32 %v304_v43, %v305_v51  ;;  %3051 = vmatpush3.bf16.msra.mxu1 %v3050_v56  ;;  %v2557_v45 = vld [vmem:[%s3999_s1 + $0x88] sm:$0xff]  ;;  %v2558_v51 = vld [vmem:[%s3999_s1 + $0x90] sm:$0xff]  ;;  %v2591_v56 = vld [vmem:[%s4000_s2 + $0x78] sm:$0xff] }
  0x45   : > { %3002 = vmatprep.subr.bf16.mxu0 %v3001_v58  ;;  %v3053_v63 = vpack.c.bf16 %v2580_v54, %v2579_v53  ;;  %3052 = vmatprep.subr.bf16.mxu1 %v3304_v52  ;;  %v303_v1 = vmax.f32 %v301_v49, %v302_v55  ;;  %v3013_v28 = vpack.c.bf16 %v2547_v21, %v2546_v15  ;;  %v2589_v49 = vld [vmem:[%s4000_s2 + $0x68] sm:$0xff]  ;;  %v2559_v53 = vld [vmem:[%s3999_s1 + $0x98] sm:$0xff]  ;;  %v2590_v55 = vld [vmem:[%s4000_s2 + $0x70] sm:$0xff] }
  0x46   : > { %v307_v0 = vrot.slane %v306_v62, 2  ;;  %v316_v3 = vsel %vm315_vm2, %v296_v60, %v289_v59  ;;  %v3017_v35 = vpack.c.bf16 %v2551_v31, %v2550_v25  ;;  %v3062_v37 = vpack.c.bf16 %v2584_v34, %v2583_v33  ;;  %v2600_v21 = vld [vmem:[%s4000_s2 + $0xb0] sm:$0xff]  ;;  %v2610_v31 = vld [vmem:[%s4001_s3 + $0x20] sm:$0xff] }
  0x47   : > { %v318_v4 = vsel %vm317_vm3, %v303_v1, %v316_v3  ;;  %v3065_v47 = vpack.c.bf16 %v2586_v40, %v2585_v39  ;;  %v3025_v50 = vpack.c.bf16 %v2557_v45, %v2556_v41  ;;  %v3068_v54 = vpack.c.bf16 %v2589_v49, %v2588_v48  ;;  %v2594_v3 = vld [vmem:[%s4000_s2 + $0x88] sm:$0xff]  ;;  %v2605_v34 = vld [vmem:[%s4000_s2 + $0xd0] sm:$0xff]  ;;  %v2613_v40 = vld [vmem:[%s4001_s3 + $0x38] sm:$0xff] }
  0x48   : > { %v308_v2 = vmax.f32 %v306_v62, %v307_v0  ;;  %3054 = vmatpush3.bf16.msra.mxu1 %v3053_v63  ;;  %v3029_v62 = vpack.c.bf16 %v2559_v53, %v2558_v51  ;;  %v2563_v63 = vld [vmem:[%s3999_s1 + $0xa8] sm:$0xff]  ;;  %v3071_v1 = vpack.c.bf16 %v2591_v56, %v2590_v55  ;;  %v1744_v48 = vld [vmem:[%s4001_s3 + $0x10] sm:$0xff]  ;;  %v1745_v49 = vld [vmem:[%s4001_s3 + $0x18] sm:$0xff] }
  0x49   : > { %3055 = vmatprep.subr.bf16.mxu1 %v3304_v52  ;;  %v3101_v53 = vpack.c.bf16 %v1745_v49, %v1744_v48 }
  0x4a   : > { %v309_v5 = vrot.slane %v308_v2, 1 }
  0x4c   : > { %v310_v6 = vmax.f32 %v308_v2, %v309_v5  ;;  %v2593_v2 = vld [vmem:[%s4000_s2 + $0x80] sm:$0xff] }
  0x4e   : > { %v320_v8 = vsel %vm319_vm4, %v310_v6, %v318_v4  ;;  %v2564_v4 = vld [vmem:[%s3999_s1 + $0xb0] sm:$0xff]  ;;  %v2565_v6 = vld [vmem:[%s3999_s1 + $0xb8] sm:$0xff] }
  0x4f   : > { %323 = vst.msk [vmem:[#allocation3 + $0x3] sm:$0xf] %vm322_vm6, %v320_v8  ;;  %v3074_v8 = vpack.c.bf16 %v2594_v3, %v2593_v2 }
  0x59   : > { %439 = vadd.xlane.f32.xlu0 %v3434_v11 }
  0x5d   : > { %441 = vadd.xlane.f32.xlu0 %v3431_v10 }
  0x61   : > { %368 = vmax.xlane.f32.xlu0 %v3483_v30  ;;  %v2544_v30 = vld [vmem:[%s3999_s1 + $0x40] sm:$0xff] }
  0x65   : > { %372 = vmax.xlane.f32.xlu0 %v3494_v46  ;;  %v1174_v46 = vld [vmem:[%s4000_s2] sm:$0xff] }
  0x66   : > { %437 = vadd.xlane.f32.xlu1 %v3428_v9 }
  0x69   : > { %445 = vadd.xlane.f32.xlu0 %v3452_v16  ;;  %v533_v16 = vld [vmem:[%s3999_s1 + $0x10] sm:$0xff] }
  0x6a   : > { %443 = vadd.xlane.f32.xlu1 %v3455_v17  ;;  %v534_v17 = vld [vmem:[%s3999_s1 + $0x18] sm:$0xff] }
  0x6d   : > { %376 = vmax.xlane.f32.xlu0 %v3504_v61 }
  0x6e   : > { %370 = vmax.xlane.f32.xlu1 %v3480_v29 }
  0x71   : > { %449 = vadd.xlane.f32.xlu0 %v3462_v19 }
  0x72   : > { %374 = vmax.xlane.f32.xlu1 %v3490_v38  ;;  %v2545_v38 = vld [vmem:[%s3999_s1 + $0x48] sm:$0xff] }
  0x73   : > { %v3009_v61 = vpack.c.bf16 %v2545_v38, %v2544_v30  ;;  %v2598_v30 = vld [vmem:[%s4000_s2 + $0xa0] sm:$0xff]  ;;  %v2599_v38 = vld [vmem:[%s4000_s2 + $0xa8] sm:$0xff] }
  0x74   : > { %v3080_v15 = vpack.c.bf16 %v2599_v38, %v2598_v30 }
  0x75   : > { %380 = vmax.xlane.f32.xlu0 %v257_v14  ;;  %v2552_v14 = vld [vmem:[%s3999_s1 + $0x70] sm:$0xff] }
  0x76   : > { %447 = vadd.xlane.f32.xlu1 %v3458_v18  ;;  %v3005_v18 = vpack.c.bf16 %v534_v17, %v533_v16  ;;  %v3021_v44 = vpack.c.bf16 %v2553_v36, %v2552_v14  ;;  %v2612_v36 = vld [vmem:[%s4001_s3 + $0x30] sm:$0xff] }
  0x77   : > { %v3095_v45 = vpack.c.bf16 %v2613_v40, %v2612_v36 }
  0x7a   : > { %378 = vmax.xlane.f32.xlu1 %v3500_v57  ;;  %v1175_v57 = vld [vmem:[%s4000_s2 + $0x8] sm:$0xff] }
  0x7b   : > { %v3056_v7 = vpack.c.bf16 %v1175_v57, %v1174_v46  ;;  %v2570_v57 = vld [vmem:[%s3999_s1 + $0xd0] sm:$0xff] }
  0x7e   : > { %451 = vadd.xlane.f32.xlu1 %v3466_v20 }
  0x82   : > { %382 = vmax.xlane.f32.xlu1 %v3515_v24  ;;  %v1177_v24 = vld [vmem:[%s4000_s2 + $0x18] sm:$0xff] }
  0x83   : > { %v3059_v32 = vpack.c.bf16 %v1177_v24, %v1176_v23 }
  0xa8   : > { %v520_v9 = vpop.permute.xlu0 %519 }
  0xa9   : > { %526 = vst.msk [vmem:[#allocation2 + $0x3] sm:$0xff] %vm525_vm7, %v520_v9  ;;  %v2595_v9 = vld [vmem:[%s4000_s2 + $0x90] sm:$0xff] }
  0xac   : > { %v522_v10 = vpop.permute.xlu0 %521 }
  0xad   : > { %527 = vst.msk [vmem:[#allocation2 + $0xb] sm:$0xff] %vm525_vm7, %v522_v10  ;;  %v2596_v10 = vld [vmem:[%s4000_s2 + $0x98] sm:$0xff] }
  0xb0   : > { %v535_v11 = vld [vmem:[#allocation2 + $0x1] sm:$0xff] }
  0xb1   : > { %2770 = vmatprep.mubr.msk.f32.mxu0 %vm542_vm8, %v535_v11  ;;  %v529_v19 = vld [vmem:[#allocation2] sm:$0xff] }
  0xb2   : > { %v705_v27 = vld [vmem:[#allocation2 + $0x2] sm:$0xff] }
  0xb3   : > { %v795_v13 = vld [vmem:[#allocation2 + $0x3] sm:$0xff] }
  0xb4   : > { %v364_v20 = vpop.permute.xlu1 %363  ;;  %v536_v29 = vld [vmem:[#allocation2 + $0x9] sm:$0xff]  ;;  %v2568_v11 = vld [vmem:[%s3999_s1 + $0xc0] sm:$0xff] }
  0xb5   : > { %367 = vst.msk [vmem:[#allocation3 + $0x3] sm:$0xf] %vm366_vm9, %v364_v20  ;;  %2771 = vmatmul.mubr.msk.f32.vlgmr.msra.gmra.mrb[0].mxu0 %vm542_vm8, %v536_v29  ;;  %v530_v22 = vld [vmem:[#allocation2 + $0x8] sm:$0xff]  ;;  %v3077_v29 = vpack.c.bf16 %v2596_v10, %v2595_v9 }
  0xb6   : > { %3004 = vmatpush3.bf16.msra.mxu0 %v3001_v58  ;;  %2781 = vmatprep.mubr.msk.f32.mxu0 %vm542_vm8, %v529_v19  ;;  %v706_v43 = vld [vmem:[#allocation2 + $0xa] sm:$0xff]  ;;  %v2562_v58 = vld [vmem:[%s3999_s1 + $0xa0] sm:$0xff] }
  0xb7   : > { %3006 = vmatprep.subr.bf16.mxu0 %v3005_v18  ;;  %v796_v60 = vld [vmem:[#allocation2 + $0xb] sm:$0xff]  ;;  %v3033_v5 = vpack.c.bf16 %v2563_v63, %v2562_v58 }
  0xb8   : > { %v885_v0 = vld [vmem:[#allocation2 + $0x4] sm:$0xff]  ;;  %v886_v17 = vld [vmem:[#allocation2 + $0xc] sm:$0xff] }
  0xb9   : > { %v2569_v19 = vld [vmem:[%s3999_s1 + $0xc8] sm:$0xff] }
  0xba   : > { %3008 = vmatpush3.bf16.msra.mxu0 %v3005_v18  ;;  %v3037_v18 = vpack.c.bf16 %v2565_v6, %v2564_v4  ;;  %v975_v20 = vld [vmem:[#allocation2 + $0x5] sm:$0xff]  ;;  %v3041_v46 = vpack.c.bf16 %v2569_v19, %v2568_v11  ;;  %v976_v23 = vld [vmem:[#allocation2 + $0xd] sm:$0xff] }
  0xbb   : > { %3010 = vmatprep.subr.bf16.mxu0 %v3009_v61  ;;  %v1065_v25 = vld [vmem:[#allocation2 + $0x6] sm:$0xff]  ;;  %v1066_v39 = vld [vmem:[#allocation2 + $0xe] sm:$0xff] }
  0xbc   : > { %v1178_v26 = vld [vmem:[#allocation3 + $0x1] sm:$0xf] }
  0xbd   : > { %2848 = vmatmul.mubr.msk.f32.vlgmr.msra.gmra.mrb[0].mxu1 %vm542_vm8, %v1178_v26  ;;  %2782 = vmatmul.mubr.msk.f32.vlgmr.msra.gmra.mrb[0].mxu0 %vm542_vm8, %v530_v22  ;;  %v1173_v42 = vld [vmem:[#allocation3] sm:$0xf]  ;;  %v1490_v22 = vld [vmem:[#allocation3 + $0x4] sm:$0xf] }
  0xbe   : > { %3057 = vmatpush3.bf16.msra.mxu1 %v3056_v7  ;;  %3012 = vmatpush3.bf16.msra.mxu0 %v3009_v61  ;;  %v1330_v59 = vld [vmem:[#allocation3 + $0x2] sm:$0xf] }
  0xbf   : > { %2792 = vmatprep.mubr.msk.f32.mxu0 %vm542_vm8, %v705_v27  ;;  %3058 = vmatprep.subr.bf16.mxu1 %v3304_v52  ;;  %v1410_v16 = vld [vmem:[#allocation3 + $0x3] sm:$0xf]  ;;  %v2603_v27 = vld [vmem:[%s4000_s2 + $0xc0] sm:$0xff] }
  0xc0   : > { %3014 = vmatprep.subr.bf16.mxu0 %v3013_v28  ;;  %2858 = vmatprep.mubr.msk.f32.mxu1 %vm3305_vm5, %v3302_v12  ;;  %v2571_v61 = vld [vmem:[%s3999_s1 + $0xd8] sm:$0xff] }
  0xc1   : > { %v2601_v7 = vld [vmem:[%s4000_s2 + $0xb8] sm:$0xff]  ;;  %v3045_v24 = vpack.c.bf16 %v2571_v61, %v2570_v57 }
  0xc2   : > { %3060 = vmatpush3.bf16.msra.mxu1 %v3059_v32  ;;  %3016 = vmatpush3.bf16.msra.mxu0 %v3013_v28  ;;  %v3083_v26 = vpack.c.bf16 %v2601_v7, %v2600_v21  ;;  %v2604_v28 = vld [vmem:[%s4000_s2 + $0xc8] sm:$0xff] }
  0xc3   : > { %3061 = vmatprep.subr.bf16.mxu1 %v3304_v52  ;;  %3018 = vmatprep.subr.bf16.mxu0 %v3017_v35  ;;  %v2611_v32 = vld [vmem:[%s4001_s3 + $0x28] sm:$0xff]  ;;  %v3086_v33 = vpack.c.bf16 %v2604_v28, %v2603_v27 }
  0xc4   : > { %v3092_v14 = vpack.c.bf16 %v2611_v32, %v2610_v31 }
  0xc5   : > { %2859 = vmatmul.mubr.msk.f32.vlgmr.msra.gmra.mrb[2].mxu1 %vm542_vm8, %v1173_v42  ;;  %2793 = vmatmul.mubr.msk.f32.vlgmr.msra.gmra.mrb[0].mxu0 %vm542_vm8, %v706_v43  ;;  %v1742_v43 = vld [vmem:[%s4001_s3] sm:$0xff] }
  0xc6   : > { %3063 = vmatpush3.bf16.msra.mxu1 %v3062_v37  ;;  %3020 = vmatpush3.bf16.msra.mxu0 %v3017_v35  ;;  %v2606_v35 = vld [vmem:[%s4000_s2 + $0xd8] sm:$0xff] }
  0xc7   : > { %2803 = vmatprep.mubr.msk.f32.mxu0 %vm542_vm8, %v795_v13  ;;  %3064 = vmatprep.subr.bf16.mxu1 %v3304_v52  ;;  %v1570_v37 = vld [vmem:[#allocation3 + $0x5] sm:$0xf]  ;;  %v3089_v41 = vpack.c.bf16 %v2606_v35, %v2605_v34 }
  0xc8   : > { %3022 = vmatprep.subr.bf16.mxu0 %v3021_v44  ;;  %2869 = vmatprep.mubr.msk.f32.mxu1 %vm3305_vm5, %v3302_v12 }
  0xca   : > { %3066 = vmatpush3.bf16.msra.mxu1 %v3065_v47  ;;  %3024 = vmatpush3.bf16.msra.mxu0 %v3021_v44  ;;  %v1743_v44 = vld [vmem:[%s4001_s3 + $0x8] sm:$0xff] }
  0xcb   : > { %3067 = vmatprep.subr.bf16.mxu1 %v3304_v52  ;;  %3026 = vmatprep.subr.bf16.mxu0 %v3025_v50  ;;  %v3098_v47 = vpack.c.bf16 %v1743_v44, %v1742_v43 }
  0xcd   : > { %2870 = vmatmul.mubr.msk.f32.vlgmr.msra.gmra.mrb[4].mxu1 %vm542_vm8, %v1330_v59  ;;  %2804 = vmatmul.mubr.msk.f32.vlgmr.msra.gmra.mrb[0].mxu0 %vm542_vm8, %v796_v60  ;;  %v392_v60 = vlaneseq }
  0xce   : > { %3069 = vmatpush3.bf16.msra.mxu1 %v3068_v54  ;;  %3028 = vmatpush3.bf16.msra.mxu0 %v3025_v50  ;;  %v1650_v50 = vld [vmem:[#allocation3 + $0x6] sm:$0xf] }
  0xcf   : > { %2814 = vmatprep.mubr.msk.f32.mxu0 %vm542_vm8, %v885_v0  ;;  %3070 = vmatprep.subr.bf16.mxu1 %v3304_v52  ;;  %v393_v0 = vand.u32 127, %v392_v60  ;;  %v3794_v2 = vshrl.u32 %v392_v60, 7  ;;  %v2618_v60 = vld [vmem:[%s4001_s3 + $0x50] sm:$0xff] }
  0xd0   : > { %3030 = vmatprep.subr.bf16.mxu0 %v3029_v62  ;;  %2880 = vmatprep.mubr.msk.f32.mxu1 %vm3305_vm5, %v3302_v12 }
  0xd1   : > { %v469_v3 = vadd.s32 4294967280, %v393_v0  ;;  %v474_v4 = vadd.s32 4294967272, %v393_v0  ;;  %v396_v10 = vsub.s32 %v393_v0, %v3794_v2 }
  0xd2   : > { %3072 = vmatpush3.bf16.msra.mxu1 %v3071_v1  ;;  %3032 = vmatpush3.bf16.msra.mxu0 %v3029_v62 }
  0xd3   : > { %3073 = vmatprep.subr.bf16.mxu1 %v3304_v52  ;;  %3034 = vmatprep.subr.bf16.mxu0 %v3033_v5 }
  0xd5   : > { %2881 = vmatmul.mubr.msk.f32.vlgmr.msra.gmra.mrb[6].mxu1 %vm542_vm8, %v1410_v16  ;;  %2815 = vmatmul.mubr.msk.f32.vlgmr.msra.gmra.mrb[0].mxu0 %vm542_vm8, %v886_v17  ;;  %v472_v16 = vsub.s32 %v469_v3, %v3794_v2 }
  0xd6   : > { %3075 = vmatpush3.bf16.msra.mxu1 %v3074_v8  ;;  %3036 = vmatpush3.bf16.msra.mxu0 %v3033_v5  ;;  %v398_v5 = vadd.s32 4294967288, %v393_v0  ;;  %v2624_v0 = vld [vmem:[%s4001_s3 + $0x78] sm:$0xff] }
  0xd7   : > { %2825 = vmatprep.mubr.msk.f32.mxu0 %vm542_vm8, %v975_v20  ;;  %3076 = vmatprep.subr.bf16.mxu1 %v3304_v52 }
  0xd8   : > { %3038 = vmatprep.subr.bf16.mxu0 %v3037_v18  ;;  %2891 = vmatprep.mubr.msk.f32.mxu1 %vm3305_vm5, %v3302_v12  ;;  %v401_v17 = vsub.s32 %v398_v5, %v3794_v2 }
  0xda   : > { %3078 = vmatpush3.bf16.msra.mxu1 %v3077_v29  ;;  %3040 = vmatpush3.bf16.msra.mxu0 %v3037_v18  ;;  %v477_v29 = vsub.s32 %v474_v4, %v3794_v2 }
  0xdb   : > { %3079 = vmatprep.subr.bf16.mxu1 %v3304_v52  ;;  %3042 = vmatprep.subr.bf16.mxu0 %v3041_v46 }
  0xdd   : > { %2892 = vmatmul.mubr.msk.f32.vlgmr.msra.gmra.mrb[8].mxu1 %vm542_vm8, %v1490_v22  ;;  %2826 = vmatmul.mubr.msk.f32.vlgmr.msra.gmra.mrb[0].mxu0 %vm542_vm8, %v976_v23 }
  0xde   : > { %3081 = vmatpush3.bf16.msra.mxu1 %v3080_v15  ;;  %3044 = vmatpush3.bf16.msra.mxu0 %v3041_v46 }
  0xdf   : > { %2836 = vmatprep.mubr.msk.f32.mxu0 %vm542_vm8, %v1065_v25  ;;  %3082 = vmatprep.subr.bf16.mxu1 %v3304_v52 }
  0xe0   : > { %3046 = vmatprep.subr.bf16.mxu0 %v3045_v24  ;;  %2902 = vmatprep.mubr.msk.f32.mxu1 %vm3305_vm5, %v3302_v12 }
  0xe2   : > { %3084 = vmatpush3.bf16.msra.mxu1 %v3083_v26  ;;  %3048 = vmatpush3.bf16.msra.mxu0 %v3045_v24 }
  0xe3   : > { %3085 = vmatprep.subr.bf16.mxu1 %v3304_v52  ;;  %3091 = vmatprep.subr.bf16.mxu0 %v3304_v52 }
  0xe5   : > { %2903 = vmatmul.mubr.msk.f32.vlgmr.msra.gmra.mrb[10].mxu1 %vm542_vm8, %v1570_v37  ;;  %2837 = vmatmul.mubr.msk.f32.vlgmr.msra.gmra.mrb[0].mxu0 %vm542_vm8, %v1066_v39 }
  0xe6   : > { %3087 = vmatpush3.bf16.msra.mxu1 %v3086_v33  ;;  %2913 = vmatprep.mubr.msk.f32.mxu1 %vm3305_vm5, %v3302_v12  ;;  %v440_v42 = vpop.xlane.xlu0 %439 }
  0xe7   : > { %3088 = vmatprep.subr.bf16.mxu1 %v3304_v52  ;;  %3093 = vmatpush3.bf16.msra.mxu0 %v3092_v14  ;;  %v454_v30 = vmul.f32 0.0625, %v440_v42 }
  0xe8   : > { %3094 = vmatprep.subr.bf16.mxu0 %v3304_v52  ;;  %2924 = vmatprep.mubr.msk.f32.mxu0 %vm3305_vm5, %v3302_v12 }
  0xe9   : > { %v478_v32 = vrot.slane %v454_v30, %v477_v29 }
  0xea   : > { %3090 = vmatpush3.bf16.msra.mxu1 %v3089_v41  ;;  %v442_v13 = vpop.xlane.xlu0 %441 }
  0xeb   : > { %3097 = vmatprep.subr.bf16.mxu1 %v3304_v52  ;;  %3096 = vmatpush3.bf16.msra.mxu0 %v3095_v45  ;;  %v455_v8 = vmul.f32 0.0625, %v442_v13 }
  0xec   : > { %3103 = vmatprep.subr.bf16.mxu0 %v3304_v52 }
  0xed   : > { %2914 = vmatmul.mubr.msk.f32.vlgmr.msra.gmra.mrb[12].mxu1 %vm542_vm8, %v1650_v50  ;;  %v484_v46 = vrot.slane %v455_v8, %v472_v16  ;;  %v2627_v8 = vld [vmem:[%s4001_s3 + $0x88] sm:$0xff] }
  0xee   : > { %v369_v51 = vpop.xlane.xlu0 %368  ;;  %3099 = vmatpush3.bf16.msra.mxu1 %v3098_v47  ;;  %2935 = vmatprep.mubr.msk.f32.mxu1 %vm3305_vm5, %v3302_v12 }
  0xef   : > { %3100 = vmatprep.subr.bf16.mxu1 %v3304_v52  ;;  %v397_v21 = vrot.slane %v369_v51, %v396_v10 }
  0xf2   : > { %3102 = vmatpush3.bf16.msra.mxu1 %v3101_v53  ;;  %v373_v55 = vpop.xlane.xlu0 %372  ;;  %v2616_v53 = vld [vmem:[%s4001_s3 + $0x40] sm:$0xff] }
  0xf3   : > { %v438_v54 = vpop.xlane.xlu1 %437  ;;  %3109 = vmatprep.subr.bf16.mxu1 %v3304_v52  ;;  %v408_v61 = vrot.slane %v373_v55, %v396_v10  ;;  %v2621_v55 = vld [vmem:[%s4001_s3 + $0x60] sm:$0xff] }
  0xf4   : > { %v453_v20 = vmul.f32 0.0625, %v438_v54  ;;  %v2617_v54 = vld [vmem:[%s4001_s3 + $0x48] sm:$0xff] }
  0xf6   : > { %v446_v58 = vpop.xlane.xlu0 %445  ;;  %v473_v31 = vrot.slane %v453_v20, %v472_v16  ;;  %v2634_v20 = vld [vmem:[%s4001_s3 + $0xb8] sm:$0xff] }
  0xf7   : > { %v444_v56 = vpop.xlane.xlu1 %443  ;;  %v457_v19 = vmul.f32 0.0625, %v446_v58  ;;  %v3104_v58 = vpack.c.bf16 %v2617_v54, %v2616_v53 }
  0xf8   : > { %v456_v9 = vmul.f32 0.0625, %v444_v56  ;;  %v480_v43 = vsel %vm479_vm11, %v478_v32, %v473_v31  ;;  %v2622_v56 = vld [vmem:[%s4001_s3 + $0x68] sm:$0xff] }
  0xf9   : > { %v493_v27 = vrot.slane %v457_v19, %v472_v16  ;;  %v2633_v19 = vld [vmem:[%s4001_s3 + $0xb0] sm:$0xff] }
  0xfa   : > { %v377_v63 = vpop.xlane.xlu0 %376  ;;  %v488_v15 = vrot.slane %v456_v9, %v477_v29  ;;  %v2631_v9 = vld [vmem:[%s4001_s3 + $0xa0] sm:$0xff] }
  0xfb   : > { %v371_v59 = vpop.xlane.xlu1 %370  ;;  %v417_v22 = vrot.slane %v377_v63, %v396_v10  ;;  %v2623_v63 = vld [vmem:[%s4001_s3 + $0x70] sm:$0xff] }
  0xfc   : > { %v402_v25 = vrot.slane %v371_v59, %v401_v17  ;;  %v489_v36 = vsel %vm479_vm11, %v488_v15, %v484_v46  ;;  %v3110_v59 = vpack.c.bf16 %v2622_v56, %v2621_v55  ;;  %v3113_v4 = vpack.c.bf16 %v2624_v0, %v2623_v63 }
  0xfd   : > { %v508_v13 = vsel %vm315_vm2, %v489_v36, %v480_v43  ;;  %v3125_v46 = vpack.c.bf16 %v2634_v20, %v2633_v19 }
  0xfe   : > { %v450_v6 = vpop.xlane.xlu0 %449  ;;  %v404_v40 = vsel %vm403_vm10, %v402_v25, %v397_v21  ;;  %v2638_v21 = vld [vmem:[%s4001_s3 + $0xd0] sm:$0xff] }
  0xff   : > { %v375_v62 = vpop.xlane.xlu1 %374  ;;  %v459_v38 = vmul.f32 0.0625, %v450_v6  ;;  %v2626_v6 = vld [vmem:[%s4001_s3 + $0x80] sm:$0xff] }
 0x100   : > { %v412_v57 = vrot.slane %v375_v62, %v401_v17  ;;  %v2619_v62 = vld [vmem:[%s4001_s3 + $0x58] sm:$0xff] }
 0x101   : > { %v502_v33 = vrot.slane %v459_v38, %v472_v16  ;;  %v3107_v5 = vpack.c.bf16 %v2619_v62, %v2618_v60 }
 0x102   : > { %v381_v24 = vpop.xlane.xlu0 %380  ;;  %v413_v34 = vsel %vm403_vm10, %v412_v57, %v408_v61  ;;  %v2636_v57 = vld [vmem:[%s4001_s3 + $0xc0] sm:$0xff]  ;;  %v2637_v61 = vld [vmem:[%s4001_s3 + $0xc8] sm:$0xff] }
 0x103   : > { %v448_v1 = vpop.xlane.xlu1 %447  ;;  %v426_v14 = vrot.slane %v381_v24, %v396_v10  ;;  %v432_v44 = vsel %vm315_vm2, %v413_v34, %v404_v40  ;;  %v2632_v10 = vld [vmem:[%s4001_s3 + $0xa8] sm:$0xff]  ;;  %v3128_v15 = vpack.c.bf16 %v2637_v61, %v2636_v57 }
 0x104   : > { %v458_v18 = vmul.f32 0.0625, %v448_v1  ;;  %v3122_v16 = vpack.c.bf16 %v2632_v10, %v2631_v9 }
 0x106   : > { %v497_v26 = vrot.slane %v458_v18, %v477_v29  ;;  %v2629_v18 = vld [vmem:[%s4001_s3 + $0x98] sm:$0xff] }
 0x107   : > { %v379_v11 = vpop.xlane.xlu1 %378 }
 0x108   : > { %v421_v7 = vrot.slane %v379_v11, %v401_v17  ;;  %v498_v41 = vsel %vm479_vm11, %v497_v26, %v493_v27  ;;  %v3116_v11 = vpack.c.bf16 %v2627_v8, %v2626_v6 }
 0x109   : > { %v509_v49 = vsel %vm317_vm3, %v498_v41, %v508_v13  ;;  %v1730_v13 = vstv %s2576_s30 }
 0x10a   : > { %v422_v37 = vsel %vm403_vm10, %v421_v7, %v417_v22  ;;  %v2639_v7 = vld [vmem:[%s4001_s3 + $0xd8] sm:$0xff] }
 0x10b   : > { %v452_v23 = vpop.xlane.xlu1 %451  ;;  %v433_v47 = vsel %vm317_vm3, %v422_v37, %v432_v44  ;;  %v3131_v24 = vpack.c.bf16 %v2639_v7, %v2638_v21 }
 0x10c   : > { %v460_v28 = vmul.f32 0.0625, %v452_v23 }
 0x10e   : > { %v506_v35 = vrot.slane %v460_v28, %v477_v29 }
 0x10f   : > { %v383_v39 = vpop.xlane.xlu1 %382 }
 0x110   : > { %v430_v42 = vrot.slane %v383_v39, %v401_v17  ;;  %v507_v45 = vsel %vm479_vm11, %v506_v35, %v502_v33  ;;  %v2628_v17 = vld [vmem:[%s4001_s3 + $0x90] sm:$0xff] }
 0x111   : > { %v510_v51 = vsel %vm319_vm4, %v507_v45, %v509_v49  ;;  %v3119_v38 = vpack.c.bf16 %v2629_v18, %v2628_v17  ;;  %v2298_v18 = vstv %s2609_s6 }
 0x112   : > { %v431_v48 = vsel %vm403_vm10, %v430_v42, %v426_v14 }
 0x113   : > { %v434_v50 = vsel %vm319_vm4, %v431_v48, %v433_v47 }
 0x114   : > { %436 = vst.msk [vmem:[#allocation4 + $0x3] sm:$0xf] %vm322_vm6, %v434_v50 }
 0x115   : > { %512 = vst.msk [vmem:[#allocation4 + $0x3] sm:$0xf] %vm366_vm9, %v510_v51 }
 0x11c   : > { %v1746_v1 = vld [vmem:[#allocation4 + $0x1] sm:$0xf]  ;;  %v2138_v23 = vld [vmem:[#allocation4 + $0x5] sm:$0xf] }
 0x11d   : > { %v1741_v3 = vld [vmem:[#allocation4] sm:$0xf]  ;;  %2925 = vmatmul.mubr.msk.f32.vlgmr.msra.gmra.mrb[2].mxu0 %vm542_vm8, %v1746_v1  ;;  %v2058_v22 = vld [vmem:[#allocation4 + $0x4] sm:$0xf] }
 0x11e   : > { %2936 = vmatmul.mubr.msk.f32.vlgmr.msra.gmra.mrb[14].mxu1 %vm542_vm8, %v1741_v3  ;;  %3105 = vmatpush3.bf16.msra.mxu0 %v3104_v58  ;;  %v1898_v29 = vld [vmem:[#allocation4 + $0x2] sm:$0xf]  ;;  %v2218_v25 = vld [vmem:[#allocation4 + $0x6] sm:$0xf] }
 0x11f   : > { %3111 = vmatpush3.bf16.msra.mxu1 %v3110_v59  ;;  %3106 = vmatprep.subr.bf16.mxu0 %v3304_v52  ;;  %v1978_v30 = vld [vmem:[#allocation4 + $0x3] sm:$0xf] }
 0x120   : > { %3112 = vmatprep.subr.bf16.mxu1 %v3304_v52  ;;  %2946 = vmatprep.mubr.msk.f32.mxu0 %vm3305_vm5, %v3302_v12 }
 0x121   : > { %2957 = vmatprep.mubr.msk.f32.mxu1 %vm3305_vm5, %v3302_v12 }
 0x122   : > { %3108 = vmatpush3.bf16.msra.mxu0 %v3107_v5 }
 0x123   : > { %3114 = vmatpush3.bf16.msra.mxu1 %v3113_v4  ;;  %3115 = vmatprep.subr.bf16.mxu0 %v3304_v52 }
 0x124   : > { %3121 = vmatprep.subr.bf16.mxu1 %v3304_v52 }
 0x125   : > { %2947 = vmatmul.mubr.msk.f32.vlgmr.msra.gmra.mrb[4].mxu0 %vm542_vm8, %v1898_v29 }
 0x126   : > { %2958 = vmatmul.mubr.msk.f32.vlgmr.msra.gmra.mrb[16].mxu1 %vm542_vm8, %v1978_v30  ;;  %3117 = vmatpush3.bf16.msra.mxu0 %v3116_v11 }
 0x127   : > { %3123 = vmatpush3.bf16.msra.mxu1 %v3122_v16  ;;  %3118 = vmatprep.subr.bf16.mxu0 %v3304_v52 }
 0x128   : > { %3124 = vmatprep.subr.bf16.mxu1 %v3304_v52  ;;  %2968 = vmatprep.mubr.msk.f32.mxu0 %vm3305_vm5, %v3302_v12 }
 0x129   : > { %2979 = vmatprep.mubr.msk.f32.mxu1 %vm3305_vm5, %v3302_v12 }
 0x12a   : > { %3120 = vmatpush3.bf16.msra.mxu0 %v3119_v38 }
 0x12b   : > { %3126 = vmatpush3.bf16.msra.mxu1 %v3125_v46  ;;  %3127 = vmatprep.subr.bf16.mxu0 %v3304_v52 }
 0x12d   : > { %2969 = vmatmul.mubr.msk.f32.vlgmr.msra.gmra.mrb[6].mxu0 %vm542_vm8, %v2058_v22  ;;  %v2384_v22 = vsub.s32 1, %v3794_v2 }
 0x12e   : > { %2980 = vmatmul.mubr.msk.f32.vlgmr.msra.gmra.mrb[18].mxu1 %vm542_vm8, %v2138_v23  ;;  %3129 = vmatpush3.bf16.msra.mxu0 %v3128_v15  ;;  %v3904_v15 = vsub.s32 0, %v3794_v2 }
 0x12f   : > { %2990 = vmatprep.mubr.msk.f32.mxu0 %vm3305_vm5, %v3302_v12  ;;  %3130 = vmatprep.subr.bf16.mxu0 %v3304_v52 }
 0x132   : > { %3132 = vmatpush3.bf16.msra.mxu0 %v3131_v24  ;;  %v2395_v24 = vsub.s32 2, %v3794_v2 }
 0x135   : > { %2991 = vmatmul.mubr.msk.f32.vlgmr.msra.gmra.mrb[8].mxu0 %vm542_vm8, %v2218_v25 }
 0x190   : > { %v1253_v26 = vpop.f32.mrb[0].mxu1 }
 0x191   : > { %v2849_v27 = vpop.f32.mrb[1].mxu1 }
 0x198   : > { %v1326_v28 = vpop.f32.mrb[2].mxu1 }
 0x199   : > { %v1327_v31 = vadd.f32 %v1326_v28, %v1253_v26  ;;  %v2860_v32 = vpop.f32.mrb[3].mxu1  ;;  %v2406_v26 = vsub.s32 3, %v3794_v2  ;;  %v1155_v28 = vstv %s528_s26 }
 0x1a0   : > { %v1405_v33 = vpop.f32.mrb[4].mxu1 }
 0x1a1   : > { %v1409_v34 = vadd.f32 %v1405_v33, %v1327_v31  ;;  %v2871_v35 = vpop.f32.mrb[5].mxu1 }
 0x1a8   : > { %v1485_v14 = vpop.f32.mrb[6].mxu1 }
 0x1a9   : > { %v1489_v36 = vadd.f32 %v1485_v14, %v1409_v34  ;;  %v2882_v37 = vpop.f32.mrb[7].mxu1 }
 0x1aa   : > { %v3306_v37 = vmov 1966171168  }
 0x1b0   : > { %v1565_v39 = vpop.f32.mrb[8].mxu1 }
 0x1b1   : > { %v1569_v40 = vadd.f32 %v1565_v39, %v1489_v36  ;;  %v2893_v12 = vpop.f32.mrb[9].mxu1  ;;  %v2328_v39 = vunpack.c.l.s4 %v3306_v37 }
 0x1b3   : > { %v2329_v12 = vunpack.c.0.s8 %v2328_v39 }
 0x1b8   : > { %v1645_v41 = vpop.f32.mrb[10].mxu1  ;;  %v3897_v52 = vpop.f32.mrb[0].mxu0 }
 0x1b9   : > { %v1649_v42 = vadd.f32 %v1645_v41, %v1569_v40  ;;  %v2904_v43 = vpop.f32.mrb[11].mxu1  ;;  %v3899_v44 = vpop.f32.mrb[1].mxu0  ;;  %v1157_v31 = vadd.f32 %v3897_v52, %v1155_v28  ;;  %v2332_v41 = vsub.s32 %v2329_v12, %v3794_v2 }
 0x1ba   : > { %v1156_v32 = vadd.f32 %v1155_v28, %v3899_v44 }
 0x1bb   : > { %v2575_v33 = vmul.f32 -1.442695, %v1157_v31 }
 0x1bc   : > { %v2574_v34 = vmul.f32 -1.442695, %v1156_v32 }
 0x1c0   : > { %v1725_v45 = vpop.f32.mrb[12].mxu1 }
 0x1c1   : > { %v1729_v47 = vadd.f32 %v1725_v45, %v1649_v42  ;;  %v2915_v48 = vpop.f32.mrb[13].mxu1 }
 0x1c3   : > { %v1731_v49 = vadd.f32 %v1730_v13, %v1729_v47 }
 0x1c5   : > { %v2608_v50 = vmul.f32 -1.442695, %v1731_v49 }
 0x1c7   : > { %3202 = vpow2.f32 %v2608_v50 }
 0x1d1   : > { %v3203_v51 = vpop.eup %3202 }
 0x1d2   : > { %v1735_v53 = vadd.f32 1.0, %v3203_v51 }
 0x1d4   : > { %3204 = vrcp.f32 %v1735_v53 }
 0x1de   : > { %v3205_v54 = vpop.eup %3204 }
 0x1df   : > { %v1738_v55 = vmul.f32 0.33333334, %v3205_v54  ;;  %v2309_v54 = vld [vmem:[%s3411_s15 + $0x8] sm:$0xff] }
 0x1e1   : > { %1739 = vst.msk [vmem:[#allocation5] sm:$0xf] %vm322_vm6, %v1738_v55 }
 0x1e8   : > { %v2642_v52 = vld.sshfl [vmem:[#allocation5] sm:$0x33 pattern:$0x75316420] }
 0x1e9   : > { %v2333_v42 = vrot.slane %v2642_v52, %v2332_v41  ;;  %v2326_v43 = vcombine.high %v2642_v52, %v2642_v52 }
 0x1eb   : > { %v2346_v13 = vrot.slane %v2333_v42, %v3904_v15  ;;  %v2340_v47 = vrot.slane %v2326_v43, %v2332_v41  ;;  %v2341_v50 = vcombine.high %v2333_v42, %v2333_v42 }
 0x1ed   : > { %v2350_v2 = vrot.slane %v2340_v47, %v3904_v15 }
 0x1f0   : > { %v1821_v56 = vpop.f32.mrb[2].mxu0 }
 0x1f1   : > { %v1894_v58 = vpop.f32.mrb[14].mxu1  ;;  %v2926_v60 = vpop.f32.mrb[3].mxu0 }
 0x1f2   : > { %v1895_v59 = vadd.f32 %v1894_v58, %v1821_v56  ;;  %v2937_v62 = vpop.f32.mrb[15].mxu1  ;;  %v2308_v56 = vld [vmem:[%s3411_s15] sm:$0xff] }
 0x1f3   : > { %v2354_v62 = vrot.slane %v2341_v50, %v3904_v15 }
 0x1f8   : > { %v1973_v63 = vpop.f32.mrb[4].mxu0 }
 0x1f9   : > { %v2053_v0 = vpop.f32.mrb[16].mxu1  ;;  %v1977_v1 = vadd.f32 %v1973_v63, %v1895_v59  ;;  %v2948_v3 = vpop.f32.mrb[5].mxu0  ;;  %v2342_v63 = vcombine.high %v2340_v47, %v2340_v47 }
 0x1fa   : > { %v2959_v5 = vpop.f32.mrb[17].mxu1 }
 0x1fb   : > { %v2057_v4 = vadd.f32 %v2053_v0, %v1977_v1 }
 0x200   : > { %v2133_v6 = vpop.f32.mrb[6].mxu0 }
 0x201   : > { %v2213_v8 = vpop.f32.mrb[18].mxu1  ;;  %v2137_v9 = vadd.f32 %v2133_v6, %v2057_v4  ;;  %v2970_v10 = vpop.f32.mrb[7].mxu0  ;;  %v2310_v4 = vld [vmem:[%s3411_s15 + $0x10] sm:$0xff] }
 0x202   : > { %v2981_v11 = vpop.f32.mrb[19].mxu1 }
 0x203   : > { %v2217_v16 = vadd.f32 %v2213_v8, %v2137_v9  ;;  %v2311_v8 = vld [vmem:[%s3411_s15 + $0x18] sm:$0xff] }
 0x208   : > { %v2293_v17 = vpop.f32.mrb[8].mxu0 }
 0x209   : > { %v2297_v19 = vadd.f32 %v2293_v17, %v2217_v16  ;;  %v2992_v20 = vpop.f32.mrb[9].mxu0 }
 0x20a   : > { %v2358_v20 = vrot.slane %v2342_v63, %v3904_v15 }
 0x20b   : > { %v2299_v29 = vadd.f32 %v2298_v18, %v2297_v19 }
 0x20d   : > { %v2641_v30 = vmul.f32 -1.442695, %v2299_v29  ;;  %v2312_v29 = vld [vmem:[%s3411_s15 + $0x20] sm:$0xff] }
 0x20f   : > { %3206 = vpow2.f32 %v2641_v30 }
 0x219   : > { %v3207_v38 = vpop.eup %3206 }
 0x21a   : > { %v2303_v46 = vadd.f32 1.0, %v3207_v38  ;;  %v2313_v38 = vld [vmem:[%s3411_s15 + $0x28] sm:$0xff] }
 0x21c   : > { %3208 = vrcp.f32 %v2303_v46 }
 0x21d   : > { %3210 = vpow2.f32 %v2575_v33 }
 0x21e   : > { %3212 = vpow2.f32 %v2574_v34 }
 0x226   : > { %v3209_v57 = vpop.eup %3208 }
 0x227   : > { %v2306_v61 = vmul.f32 0.33333334, %v3209_v57  ;;  %v3211_v35 = vpop.eup %3210 }
 0x228   : > { %v3213_v14 = vpop.eup %3212  ;;  %v1165_v36 = vadd.f32 1.0, %v3211_v35 }
 0x229   : > { %2307 = vst.msk [vmem:[#allocation6] sm:$0xf] %vm322_vm6, %v2306_v61  ;;  %v1164_v40 = vadd.f32 1.0, %v3213_v14 }
 0x22a   : > { %3214 = vrcp.f32 %v1165_v36 }
 0x22b   : > { %3216 = vrcp.f32 %v1164_v40 }
 0x230   : > { %v2317_v21 = vld [vmem:[#allocation6] sm:$0xf] }
 0x231   : > { %v2374_v7 = vrot.slane %v2317_v21, %v3904_v15  ;;  %v2385_v23 = vrot.slane %v2317_v21, %v2384_v22  ;;  %v2396_v25 = vrot.slane %v2317_v21, %v2395_v24  ;;  %v2407_v27 = vrot.slane %v2317_v21, %v2406_v26  ;;  %v2314_v15 = vld [vmem:[%s3411_s15 + $0x30] sm:$0xff] }
 0x233   : > { %2380 = vbcast.lane.b32.xlu1 %v2374_v7, 264  ;;  %2376 = vbcast.lane.b32.xlu0 %v2374_v7, 256 }
 0x234   : > { %v3215_v44 = vpop.eup %3214 }
 0x235   : > { %v3217_v45 = vpop.eup %3216  ;;  %v1171_v48 = vmul.f32 0.33333334, %v3215_v44 }
 0x236   : > { %v1170_v49 = vmul.f32 0.33333334, %v3217_v45 }
 0x237   : > { %2387 = vbcast.lane.b32.xlu1 %v2385_v23, 256  ;;  %2391 = vbcast.lane.b32.xlu0 %v2385_v23, 264  ;;  %v2364_v51 = vadd.f32 %v2346_v13, %v1171_v48  ;;  %v2366_v5 = vadd.f32 %v2350_v2, %v1171_v48  ;;  %v2368_v19 = vadd.f32 %v2354_v62, %v1171_v48 }
 0x238   : > { %v2363_v53 = vadd.f32 %v2346_v13, %v1170_v49  ;;  %v2365_v3 = vadd.f32 %v2350_v2, %v1170_v49  ;;  %v2367_v16 = vadd.f32 %v2354_v62, %v1170_v49  ;;  %v2369_v22 = vadd.f32 %v2358_v20, %v1170_v49 }
 0x239   : > { %v2370_v23 = vadd.f32 %v2358_v20, %v1171_v48 }
 0x23b   : > { %2398 = vbcast.lane.b32.xlu1 %v2396_v25, 256  ;;  %2402 = vbcast.lane.b32.xlu0 %v2396_v25, 264  ;;  %v2315_v25 = vld [vmem:[%s3411_s15 + $0x38] sm:$0xff]  ;;  %s3233_s15 = scalar_lea.vmem %s3949_s11, 1024 }
 0x23c   : > { %p3234_p9 = scmp.ne.s32.totalorder %s3949_s11, %s3233_s15  ;;  %p3241_p0 = scmp.lt.s32.totalorder %s3239_s23, %s3233_s15 }
 0x23e   : > { %p3235_p10 = pnand %p3234_p9, %p3378_p5  ;;  %p3242_p1 = por %p3241_p0, %p3240_p13 }
 0x23f   : > { %2409 = vbcast.lane.b32.xlu1 %v2407_v27, 256  ;;  %2413 = vbcast.lane.b32.xlu0 %v2407_v27, 264 }
 0x240   : > { %p3236_p12 = pneg %p3235_p10 }
 0x242   : > { %p3243_p2 = pnand %p3242_p1, %p3236_p12 }
 0x2a5   : > { %v2381_v55 = vpop.permute.xlu1 %2380  ;;  %v2377_v58 = vpop.permute.xlu0 %2376 }
 0x2a6   : > { %v2416_v59 = vadd.f32 %v2381_v55, %v2364_v51  ;;  %v2415_v60 = vadd.f32 %v2377_v58, %v2363_v53 }
 0x2a8   : > { %v2424_v0 = vmul.f32 %v2416_v59, %v2309_v54  ;;  %v2423_v1 = vmul.f32 %v2415_v60, %v2308_v56 }
 0x2a9   : > { %v2388_v6 = vpop.permute.xlu1 %2387  ;;  %v2392_v9 = vpop.permute.xlu0 %2391 }
 0x2aa   : > { %2432 = vst.msk [vmem:[%s3923_s9 + $0x8] sm:$0xff] %vm252_vm0, %v2424_v0  ;;  %2431 = vst.msk [vmem:[%s3923_s9] sm:$0xff] %vm252_vm0, %v2423_v1  ;;  %v2417_v10 = vadd.f32 %v2388_v6, %v2365_v3  ;;  %v2418_v11 = vadd.f32 %v2392_v9, %v2366_v5 }
 0x2ac   : > { %v2425_v17 = vmul.f32 %v2417_v10, %v2310_v4  ;;  %v2426_v18 = vmul.f32 %v2418_v11, %v2311_v8 }
 0x2ad   : > { %v2399_v30 = vpop.permute.xlu1 %2398  ;;  %v2403_v46 = vpop.permute.xlu0 %2402 }
 0x2ae   : > { %2433 = vst.msk [vmem:[%s3923_s9 + $0x10] sm:$0xff] %vm252_vm0, %v2425_v17  ;;  %2434 = vst.msk [vmem:[%s3923_s9 + $0x18] sm:$0xff] %vm252_vm0, %v2426_v18  ;;  %v2419_v57 = vadd.f32 %v2399_v30, %v2367_v16  ;;  %v2420_v61 = vadd.f32 %v2403_v46, %v2368_v19 }
 0x2b0   : > { %v2427_v21 = vmul.f32 %v2419_v57, %v2312_v29  ;;  %v2428_v7 = vmul.f32 %v2420_v61, %v2313_v38 }
 0x2b1   : > { %v2410_v24 = vpop.permute.xlu1 %2409  ;;  %v2414_v26 = vpop.permute.xlu0 %2413 }
 0x2b2   : > { %2435 = vst.msk [vmem:[%s3923_s9 + $0x20] sm:$0xff] %vm252_vm0, %v2427_v21  ;;  %2436 = vst.msk [vmem:[%s3923_s9 + $0x28] sm:$0xff] %vm252_vm0, %v2428_v7  ;;  %v2421_v27 = vadd.f32 %v2410_v24, %v2369_v22  ;;  %v2422_v28 = vadd.f32 %v2414_v26, %v2370_v23 }
 0x2b4   : > { %v2429_v31 = vmul.f32 %v2421_v27, %v2314_v15  ;;  %v2430_v32 = vmul.f32 %v2422_v28, %v2315_v25 }
 0x2b6   : > { %2437 = vst.msk [vmem:[%s3923_s9 + $0x30] sm:$0xff] %vm252_vm0, %v2429_v31  ;;  %2438 = vst.msk [vmem:[%s3923_s9 + $0x38] sm:$0xff] %vm252_vm0, %v2430_v32 }
 0x2b7   : > { %3246 = shalt.err (!%p3243_p2)
}
 0x2b8   : > { %s3247_s25 = scalar_lea.hbm %s3947_s14, 1024  ;;  %s3251_s26 = scalar_lea.hbm %s4003_s5, 2048 }
 0x2b9   : > { %p3248_p3 = scmp.ne.s32.totalorder %s3947_s14, %s3247_s25  ;;  %p3252_p8 = scmp.lt.u32.totalorder %s3947_s14, %s4003_s5 }
 0x2ba   : > { %p3253_p11 = scmp.lt.u32.totalorder %s3251_s26, %s3247_s25  ;;  %p3255_p10 = scmp.lt.u32.totalorder %s3247_s25, %s3947_s14 }
 0x2bb   : > { %p3249_p4 = pnand %p3248_p3, %p3378_p5 }
 0x2bc   : > { %p3254_p9 = por %p3253_p11, %p3252_p8 }
 0x2bd   : > { %p3250_p7 = pneg %p3249_p4 }
 0x2be   : > { %p3256_p12 = por %p3255_p10, %p3254_p9 }
 0x2c0   : > { %p3257_p13 = pnand %p3256_p12, %p3250_p7 }
 0x2c2   : > { %3260 = shalt.err (!%p3257_p13)
}
 0x2c3   : > { %s3308_s9 = smov 128   ;;  %s3309_s10 = smov 8  }
 0x2c4   : > { %3149 = dma.vmem_to_hbm [thread:$0]  (%p3378_p5), %s3949_s11, 1024, %s3947_s14, %s3957_s22, %s3308_s9, %s3308_s9, %s3309_s10  }
 0x2c5 PF: > { %p3161_p0 = scmp.ge.s32.totalorder %s3299_s21, 2  ;;  %s2468_s12 = sand.u32 1, %s3287_s18  }
 0x2c6   : > { %s2469_s13 = scalar_lea.sflag [#allocation8], %s2468_s12 }
 0x2c7   : > { %p3156_p1 = pnand %p3161_p0, %p3382_p6 }
 0x2c9   : > { %3282 = dma.done.wait (!%p3156_p1), %s2469_s13, 1024  }
 0x2ca   : > { %3284 = vsyncadd (!%p3156_p1), %s2469_s13, 4294966272  ;;  %p16_p2 = scmp.ge.s32.totalorder %s3365_s24, 4   ;;  %s4007_s18 = smov %s3291_s19 }
 0x2cb   : > { %s4008_s19 = smov %s3295_s20  ;;  %s4009_s20 = smov %s3376_s27 }
 0x2cc   : > { %s4010_s21 = smov %s3365_s24  ;;  %18 = sbr.rel (!%p16_p2) target bundleno = 4 (0x4), region = 98 }
 0x2d3   :  { %2474 = vsyncpa [#allocation8], 1 }
 0x2d4   :  { %2476 = vsyncpa [#allocation8 + $0x1], 1 }
 0x2d5   :  { %2477 = vsyncpa [#allocation9], 1 }
 0x2d6   :  { %2479 = vsyncpa [#allocation9 + $0x1], 1 }

</bundles_post_ra>
